<compile_context>
chip_gen: v7x
topology: tpu7x:2x2x1
jax: 0.10.0
libtpu: 0.0.40
codegen_flags: <defaults>
</compile_context>

<pallas_src>
import functools

import jax
import jax.numpy as jnp
from jax.experimental import pallas as pl
from jax.experimental.pallas import tpu as pltpu

INPUT_DIM = 100
HIDDEN_DIM = 128
LANE = 128


def _round_up(n, m):
    return ((n + m - 1) // m) * m


def discriminator_kernel(x_ref, w1_ref, b1_ref, w2_ref, b2_ref, w3_ref, b3_ref, o_ref):
    # Fused 3-layer MLP for one batch tile. All three matmuls are full
    # lane-aligned MXU tiles with fp32 accumulation; LeakyReLU and bias adds
    # run in fp32 on the VPU.
    h1 = jnp.dot(x_ref[...], w1_ref[...], preferred_element_type=jnp.float32) + b1_ref[...]
    h1 = jnp.where(h1 > 0, h1, 0.2 * h1)  # LeakyReLU(0.2)

    h2 = jnp.dot(h1.astype(w2_ref.dtype), w2_ref[...],
                 preferred_element_type=jnp.float32) + b2_ref[...]
    h2 = jnp.where(h2 > 0, h2, 0.2 * h2)  # LeakyReLU(0.2)

    # Final layer: W3 is padded from (H, 1) to (H, 128) in the wrapper, so this
    # is a full MXU tile and the store below is a lane-dense unmasked vst.
    out = jnp.dot(h2.astype(w3_ref.dtype), w3_ref[...],
                  preferred_element_type=jnp.float32) + b3_ref[...]
    o_ref[...] = out.astype(o_ref.dtype)


@functools.partial(jax.jit, static_argnames=("bm", "compute_dtype"))
def discriminator_forward(x, params, *, bm=512, compute_dtype=jnp.bfloat16):
    """x: (B, input_dim) float32. Returns (B, 1) float32."""
    w1, b1, w2, b2, w3, b3 = params
    B, D = x.shape
    H = w1.shape[1]
    assert bm % 8 == 0, "batch tile must be sublane-aligned"

    D_pad = _round_up(D, LANE)  # 100 -> 128: lane/sublane aligned MXU feed (exact: zero pad)
    N_pad = LANE                # pad the degenerate N=1 output to a full 128-lane tile

    # Zero-pad the contraction dim (extra x columns and W1 rows are all-zero).
    x_p = jnp.pad(x, ((0, 0), (0, D_pad - D))) if D_pad != D else x
    w1_p = jnp.pad(w1, ((0, D_pad - D), (0, 0))) if D_pad != D else w1
    # Pad the last layer to 128 output columns; wrapper slices column 0 back out.
    w3_p = jnp.pad(w3, ((0, 0), (0, N_pad - w3.shape[1])))
    b3_p = jnp.pad(b3, ((0, 0), (0, N_pad - b3.shape[1])))

    # Batch tiling: big tiles; pad ragged batches and slice the result back.
    bm_eff = min(bm, _round_up(B, 8))
    B_pad = _round_up(B, bm_eff)
    if B_pad != B:
        x_p = jnp.pad(x_p, ((0, B_pad - B), (0, 0)))

    grid = (B_pad // bm_eff,)

    # Note: weight/bias index_maps are constant, so the pipeline fetches them
    # once and keeps them resident; single-buffering them (pl.Buffered(1))
    # would only save ~120 KB of VMEM, which is not a constraint here.
    out = pl.pallas_call(
        discriminator_kernel,
        out_shape=jax.ShapeDtypeStruct((B_pad, N_pad), jnp.float32),
        grid_spec=pltpu.PrefetchScalarGridSpec(
            num_scalar_prefetch=0,
            grid=grid,
            in_specs=[
                pl.BlockSpec((bm_eff, D_pad), lambda i: (i, 0)),  # x tile
                pl.BlockSpec((D_pad, H), lambda i: (0, 0)),       # W1 (grid-invariant)
                pl.BlockSpec((1, H), lambda i: (0, 0)),           # b1
                pl.BlockSpec((H, H), lambda i: (0, 0)),           # W2
                pl.BlockSpec((1, H), lambda i: (0, 0)),           # b2
                pl.BlockSpec((H, N_pad), lambda i: (0, 0)),       # W3 (padded to 128 cols)
                pl.BlockSpec((1, N_pad), lambda i: (0, 0)),       # b3 (padded)
            ],
            out_specs=pl.BlockSpec((bm_eff, N_pad), lambda i: (i, 0)),
        ),
        compiler_params=pltpu.CompilerParams(
            dimension_semantics=("parallel",),  # batch axis shards across TCs on v7x
        ),
    )(
        x_p.astype(compute_dtype),
        w1_p.astype(compute_dtype),
        b1.astype(jnp.float32),
        w2.astype(compute_dtype),
        b2.astype(jnp.float32),
        w3_p.astype(compute_dtype),
        b3_p.astype(jnp.float32),
    )

    # Drop batch padding and the 127 padded output lanes (layout plumbing only).
    return out[:B, :1]


def init_params(key, input_dim=INPUT_DIM, hidden_dim=HIDDEN_DIM):
    """Deterministic init mimicking PyTorch Linear default (U[-1/sqrt(fan_in), +])."""
    ks = jax.random.split(key, 6)

    def uniform(k, shape, fan_in):
        bound = 1.0 / jnp.sqrt(jnp.float32(fan_in))
        return jax.random.uniform(k, shape, jnp.float32, -bound, bound)

    w1 = uniform(ks[0], (input_dim, hidden_dim), input_dim)
    b1 = uniform(ks[1], (1, hidden_dim), input_dim)
    w2 = uniform(ks[2], (hidden_dim, hidden_dim), hidden_dim)
    b2 = uniform(ks[3], (1, hidden_dim), hidden_dim)
    w3 = uniform(ks[4], (hidden_dim, 1), hidden_dim)
    b3 = uniform(ks[5], (1, 1), hidden_dim)
    return (w1, b1, w2, b2, w3, b3)


def reference_forward(x, params, compute_dtype=jnp.float32):
    """Pure-JAX reference with the same operand dtype / fp32-accum convention."""
    w1, b1, w2, b2, w3, b3 = params
    h1 = jnp.dot(x.astype(compute_dtype), w1.astype(compute_dtype),
                 preferred_element_type=jnp.float32) + b1
    h1 = jnp.where(h1 > 0, h1, 0.2 * h1)
    h2 = jnp.dot(h1.astype(compute_dtype), w2.astype(compute_dtype),
                 preferred_element_type=jnp.float32) + b2
    h2 = jnp.where(h2 > 0, h2, 0.2 * h2)
    return jnp.dot(h2.astype(compute_dtype), w3.astype(compute_dtype),
                   preferred_element_type=jnp.float32) + b3


if __name__ == "__main__":
    key = jax.random.PRNGKey(0)
    k_x1, k_x2, k_p = jax.random.split(key, 3)
    params = init_params(k_p)

    # Case 1: batch a multiple of the tile -> 2 grid steps with bm=512
    # (keeps both v7x TensorCores busy).
    B1 = 1024
    x1 = jax.random.normal(k_x1, (B1, INPUT_DIM), dtype=jnp.float32)

    out_bf16 = jax.block_until_ready(discriminator_forward(x1, params))  # default bf16 MXU feed
    out_fp32 = jax.block_until_ready(
        discriminator_forward(x1, params, compute_dtype=jnp.float32))

    ref_fp32 = reference_forward(x1, params, jnp.float32)
    ref_bf16 = reference_forward(x1, params, jnp.bfloat16)

    assert out_fp32.shape == (B1, 1)
    assert out_bf16.shape == (B1, 1)
    assert jnp.allclose(out_fp32, ref_fp32, atol=1e-4, rtol=1e-4), "fp32 mismatch vs reference"
    assert jnp.allclose(out_bf16, ref_bf16, atol=2e-3, rtol=2e-3), "bf16 mismatch vs reference"

    # Case 2: ragged batch (exercises the pad-and-slice tail path).
    B2 = 300
    x2 = jax.random.normal(k_x2, (B2, INPUT_DIM), dtype=jnp.float32)
    out2 = jax.block_until_ready(
        discriminator_forward(x2, params, compute_dtype=jnp.float32))
    ref2 = reference_forward(x2, params, jnp.float32)
    assert out2.shape == (B2, 1)
    assert jnp.allclose(out2, ref2, atol=1e-4, rtol=1e-4), "ragged-batch mismatch vs reference"

    print("KERNEL_OK")
</pallas_src>

<mosaic_0001>
module attributes {stable_mosaic.version = 11 : i64} {
  func.func @discriminator_kernel(%arg0: i32, %arg1: memref<512x128xbf16, #tpu.memory_space<vmem>>, %arg2: memref<128x128xbf16, #tpu.memory_space<vmem>>, %arg3: memref<1x128xf32, #tpu.memory_space<vmem>>, %arg4: memref<128x128xbf16, #tpu.memory_space<vmem>>, %arg5: memref<1x128xf32, #tpu.memory_space<vmem>>, %arg6: memref<128x128xbf16, #tpu.memory_space<vmem>>, %arg7: memref<1x128xf32, #tpu.memory_space<vmem>>, %arg8: memref<512x128xf32, #tpu.memory_space<vmem>>) attributes {dimension_semantics = [#tpu.dimension_semantics<parallel>], iteration_bounds = array<i64: 2>, scalar_prefetch = 0 : i64, scratch_operands = 0 : i64, tpu.core_type = #tpu.core_type<tc>, window_params = [{transform_indices = @transform_0, window_bounds = array<i64: 512, 128>}, {pipeline_mode = #tpu.pipeline_mode<synchronous>, transform_indices = @transform_1, window_bounds = array<i64: 128, 128>}, {pipeline_mode = #tpu.pipeline_mode<synchronous>, transform_indices = @transform_2, window_bounds = array<i64: 1, 128>}, {pipeline_mode = #tpu.pipeline_mode<synchronous>, transform_indices = @transform_3, window_bounds = array<i64: 128, 128>}, {pipeline_mode = #tpu.pipeline_mode<synchronous>, transform_indices = @transform_4, window_bounds = array<i64: 1, 128>}, {pipeline_mode = #tpu.pipeline_mode<synchronous>, transform_indices = @transform_5, window_bounds = array<i64: 128, 128>}, {pipeline_mode = #tpu.pipeline_mode<synchronous>, transform_indices = @transform_6, window_bounds = array<i64: 1, 128>}, {transform_indices = @transform_7, window_bounds = array<i64: 512, 128>}]} {
    %c0 = arith.constant 0 : index
    %c0_0 = arith.constant 0 : index
    %0 = vector.load %arg1[%c0, %c0_0] : memref<512x128xbf16, #tpu.memory_space<vmem>>, vector<512x128xbf16>
    %c0_1 = arith.constant 0 : index
    %c0_2 = arith.constant 0 : index
    %1 = vector.load %arg2[%c0_1, %c0_2] : memref<128x128xbf16, #tpu.memory_space<vmem>>, vector<128x128xbf16>
    %cst = arith.constant dense<0.000000e+00> : vector<512x128xf32>
    %2 = tpu.matmul %0, %1, %cst {dimension_numbers = #tpu.dot_dimension_numbers<[1], [0], [0], [1], [0, 0, 1, 1], [], []>} : vector<512x128xbf16>, vector<128x128xbf16>, vector<512x128xf32> -> vector<512x128xf32>
    %c0_3 = arith.constant 0 : index
    %c0_4 = arith.constant 0 : index
    %3 = vector.load %arg3[%c0_3, %c0_4] : memref<1x128xf32, #tpu.memory_space<vmem>>, vector<1x128xf32>
    %4 = vector.broadcast %3 : vector<1x128xf32> to vector<512x128xf32>
    %5 = arith.addf %2, %4 : vector<512x128xf32>
    %cst_5 = arith.constant 0.000000e+00 : f32
    %6 = vector.broadcast %cst_5 : f32 to vector<512x128xf32>
    %7 = arith.cmpf ogt, %5, %6 : vector<512x128xf32>
    %cst_6 = arith.constant 2.000000e-01 : f32
    %8 = vector.broadcast %cst_6 : f32 to vector<512x128xf32>
    %9 = arith.mulf %8, %5 : vector<512x128xf32>
    %10 = arith.select %7, %5, %9 : vector<512x128xi1>, vector<512x128xf32>
    %11 = arith.truncf %10 : vector<512x128xf32> to vector<512x128xbf16>
    %c0_7 = arith.constant 0 : index
    %c0_8 = arith.constant 0 : index
    %12 = vector.load %arg4[%c0_7, %c0_8] : memref<128x128xbf16, #tpu.memory_space<vmem>>, vector<128x128xbf16>
    %cst_9 = arith.constant dense<0.000000e+00> : vector<512x128xf32>
    %13 = tpu.matmul %11, %12, %cst_9 {dimension_numbers = #tpu.dot_dimension_numbers<[1], [0], [0], [1], [0, 0, 1, 1], [], []>} : vector<512x128xbf16>, vector<128x128xbf16>, vector<512x128xf32> -> vector<512x128xf32>
    %c0_10 = arith.constant 0 : index
    %c0_11 = arith.constant 0 : index
    %14 = vector.load %arg5[%c0_10, %c0_11] : memref<1x128xf32, #tpu.memory_space<vmem>>, vector<1x128xf32>
    %15 = vector.broadcast %14 : vector<1x128xf32> to vector<512x128xf32>
    %16 = arith.addf %13, %15 : vector<512x128xf32>
    %cst_12 = arith.constant 0.000000e+00 : f32
    %17 = vector.broadcast %cst_12 : f32 to vector<512x128xf32>
    %18 = arith.cmpf ogt, %16, %17 : vector<512x128xf32>
    %cst_13 = arith.constant 2.000000e-01 : f32
    %19 = vector.broadcast %cst_13 : f32 to vector<512x128xf32>
    %20 = arith.mulf %19, %16 : vector<512x128xf32>
    %21 = arith.select %18, %16, %20 : vector<512x128xi1>, vector<512x128xf32>
    %22 = arith.truncf %21 : vector<512x128xf32> to vector<512x128xbf16>
    %c0_14 = arith.constant 0 : index
    %c0_15 = arith.constant 0 : index
    %23 = vector.load %arg6[%c0_14, %c0_15] : memref<128x128xbf16, #tpu.memory_space<vmem>>, vector<128x128xbf16>
    %cst_16 = arith.constant dense<0.000000e+00> : vector<512x128xf32>
    %24 = tpu.matmul %22, %23, %cst_16 {dimension_numbers = #tpu.dot_dimension_numbers<[1], [0], [0], [1], [0, 0, 1, 1], [], []>} : vector<512x128xbf16>, vector<128x128xbf16>, vector<512x128xf32> -> vector<512x128xf32>
    %c0_17 = arith.constant 0 : index
    %c0_18 = arith.constant 0 : index
    %25 = vector.load %arg7[%c0_17, %c0_18] : memref<1x128xf32, #tpu.memory_space<vmem>>, vector<1x128xf32>
    %26 = vector.broadcast %25 : vector<1x128xf32> to vector<512x128xf32>
    %27 = arith.addf %24, %26 : vector<512x128xf32>
    %c0_19 = arith.constant 0 : index
    %c0_20 = arith.constant 0 : index
    %28 = vector.load %arg8[%c0_19, %c0_20] : memref<512x128xf32, #tpu.memory_space<vmem>>, vector<512x128xf32>
    tpu.vector_store %arg8[%c0_19, %c0_20], %27 {strides = array<i32>} : memref<512x128xf32, #tpu.memory_space<vmem>>, vector<512x128xf32>,
    return
  }
  func.func @transform_0(%arg0: i32) -> (i32, i32) {
    %c0_i32 = arith.constant 0 : i32
    %c0_i32_0 = arith.constant 0 : i32
    return %arg0, %c0_i32 : i32, i32
  }
  func.func @transform_1(%arg0: i32) -> (i32, i32) {
    %c0_i32 = arith.constant 0 : i32
    %c0_i32_0 = arith.constant 0 : i32
    %c0_i32_1 = arith.constant 0 : i32
    return %c0_i32, %c0_i32_0 : i32, i32
  }
  func.func @transform_2(%arg0: i32) -> (i32, i32) {
    %c0_i32 = arith.constant 0 : i32
    %c0_i32_0 = arith.constant 0 : i32
    %c0_i32_1 = arith.constant 0 : i32
    return %c0_i32, %c0_i32_0 : i32, i32
  }
  func.func @transform_3(%arg0: i32) -> (i32, i32) {
    %c0_i32 = arith.constant 0 : i32
    %c0_i32_0 = arith.constant 0 : i32
    %c0_i32_1 = arith.constant 0 : i32
    return %c0_i32, %c0_i32_0 : i32, i32
  }
  func.func @transform_4(%arg0: i32) -> (i32, i32) {
    %c0_i32 = arith.constant 0 : i32
    %c0_i32_0 = arith.constant 0 : i32
    %c0_i32_1 = arith.constant 0 : i32
    return %c0_i32, %c0_i32_0 : i32, i32
  }
  func.func @transform_5(%arg0: i32) -> (i32, i32) {
    %c0_i32 = arith.constant 0 : i32
    %c0_i32_0 = arith.constant 0 : i32
    %c0_i32_1 = arith.constant 0 : i32
    return %c0_i32, %c0_i32_0 : i32, i32
  }
  func.func @transform_6(%arg0: i32) -> (i32, i32) {
    %c0_i32 = arith.constant 0 : i32
    %c0_i32_0 = arith.constant 0 : i32
    %c0_i32_1 = arith.constant 0 : i32
    return %c0_i32, %c0_i32_0 : i32, i32
  }
  func.func @transform_7(%arg0: i32) -> (i32, i32) {
    %c0_i32 = arith.constant 0 : i32
    %c0_i32_0 = arith.constant 0 : i32
    return %arg0, %c0_i32 : i32, i32
  }
}

</mosaic_0001>

<bundles_post_ra>
// kernel: discriminator_forward.1
= control target key start
LH: loop header
LB: loop body
LE: loop exit
PB: predicated region body
PF: predicated region fallthrough
CT: control target
= control target key end

     0   :  { %s2745_s24 = smov 0   ;;  %s3402_s0 = inlined_call_operand.vmem [shape: bf16[1024,128], index: 0, kind: input, shape index: {}]   ;;  %s3403_s1 = inlined_call_operand.vmem [shape: bf16[128,128], index: 1, kind: input, shape index: {}]   ;;  %s3404_s2 = inlined_call_operand.vmem [shape: f32[1,128], index: 2, kind: input, shape index: {}]   ;;  %s3405_s3 = inlined_call_operand.vmem [shape: bf16[128,128], index: 3, kind: input, shape index: {}]   ;;  %s3406_s4 = inlined_call_operand.vmem [shape: f32[1,128], index: 4, kind: input, shape index: {}]   ;;  %s3407_s5 = inlined_call_operand.vmem [shape: bf16[128,128], index: 5, kind: input, shape index: {}]   ;;  %s3408_s6 = inlined_call_operand.vmem [shape: f32[1,128], index: 6, kind: input, shape index: {}]   ;;  %s3409_s7 = inlined_call_operand.vmem [shape: f32[1024,128], index: 7, kind: output, shape index: {}]  }
   0x1 LB: > { %s2187_s25 = sadd.s32 4294967295, %s2703_s24   ;;  %p2191_p0 = scmp.ge.s32.totalorder %s2703_s24, 1  ;;  %s2703_s24 = sphi %s2745_s24, %s17_s24  }
   0x2   : > { %p238_p1 = scmp.lt.s32.totalorder %s2703_s24, 3 }
   0x4   : > { %p239_p2 = pnand %p2191_p0, %p238_p1 }
   0x5   : > { %v2641_v0 = vld [vmem:[%s3403_s1] sm:$0xff] (!%p239_p2)   ;;  %s2192_s28 = sshll.u32 (!%p239_p2), %s2187_s25, 6  ;;  %v2642_v1 = vld [vmem:[%s3403_s1 + $0x8] sm:$0xff] (!%p239_p2)   ;;  %v2643_v2 = vld [vmem:[%s3403_s1 + $0x10] sm:$0xff] (!%p239_p2)  }
   0x6   : > { %242 = sbr.rel (%p239_p2) target bundleno = 822 (0x336), region = 48  ;;  %p271_p3 = scmp.lt.s32.totalorder (!%p239_p2), %s2192_s28, 127  ;;  %2377 = vmatprep.subr.bf16.mxu0 (!%p239_p2), %v2641_v0  ;;  %2617 = vmatprep.subr.bf16.mxu1 (!%p239_p2), %v2641_v0  ;;  %v2644_v3 = vld [vmem:[%s3403_s1 + $0x18] sm:$0xff] (!%p239_p2)   ;;  %v2645_v5 = vld [vmem:[%s3403_s1 + $0x20] sm:$0xff] (!%p239_p2)   ;;  %v2646_v6 = vld [vmem:[%s3403_s1 + $0x28] sm:$0xff] (!%p239_p2)  }
   0x7   : > { %2378 = vmatpush3.bf16.msra.mxu0 (!%p239_p2), %v2641_v0  ;;  %2625 = vmatpush3.bf16.msra.mxu1 (!%p239_p2), %v2641_v0  ;;  %v2647_v7 = vld [vmem:[%s3403_s1 + $0x30] sm:$0xff] (!%p239_p2)   ;;  %v2648_v8 = vld [vmem:[%s3403_s1 + $0x38] sm:$0xff] (!%p239_p2)   ;;  %v2681_v18 = vld [vmem:[%s3405_s3] sm:$0xff] (!%p239_p2)  }
   0x8   : > { %2379 = vmatprep.subr.bf16.mxu0 (!%p239_p2), %v2642_v1  ;;  %2618 = vmatprep.subr.bf16.mxu1 (!%p239_p2), %v2642_v1  ;;  %v2682_v19 = vld [vmem:[%s3405_s3 + $0x8] sm:$0xff] (!%p239_p2)   ;;  %v2683_v24 = vld [vmem:[%s3405_s3 + $0x10] sm:$0xff] (!%p239_p2)   ;;  %v2684_v25 = vld [vmem:[%s3405_s3 + $0x18] sm:$0xff] (!%p239_p2)  }
   0x9   : > { %v2685_v30 = vld [vmem:[%s3405_s3 + $0x20] sm:$0xff] (!%p239_p2)   ;;  %v2686_v31 = vld [vmem:[%s3405_s3 + $0x28] sm:$0xff] (!%p239_p2)   ;;  %v2687_v36 = vld [vmem:[%s3405_s3 + $0x30] sm:$0xff] (!%p239_p2)  }
   0xa   : > { %v2688_v47 = vld [vmem:[%s3405_s3 + $0x38] sm:$0xff] (!%p239_p2)   ;;  %v2844_v48 = vld [vmem:[%s3404_s2] ss:$0 sm:$0xff] (!%p239_p2) }
   0xb   : > { %2380 = vmatpush3.bf16.msra.mxu0 (!%p239_p2), %v2642_v1  ;;  %2626 = vmatpush3.bf16.msra.mxu1 (!%p239_p2), %v2642_v1  ;;  %v2689_v63 = vld [vmem:[%s3407_s5] sm:$0xff] (!%p239_p2)   ;;  %v2690_v1 = vld [vmem:[%s3407_s5 + $0x8] sm:$0xff] (!%p239_p2)  }
   0xc   : > { %2381 = vmatprep.subr.bf16.mxu0 (!%p239_p2), %v2643_v2  ;;  %2619 = vmatprep.subr.bf16.mxu1 (!%p239_p2), %v2643_v2 }
   0xd   : > { %s3412_s28 = smov (!%p271_p3, %s2192_s28), 127 }
   0xe   : > { %s2193_s10 = sshll.u32 %s3412_s28, 2  ;;  %s2195_s19 = sshll.u32 %s3412_s28, 3 }
   0xf   : > { %s2768_s13 = scalar_lea.vmem %s3402_s0, %s2193_s10  ;;  %2382 = vmatpush3.bf16.msra.mxu0 %v2643_v2  ;;  %2627 = vmatpush3.bf16.msra.mxu1 %v2643_v2  ;;  %s3269_s23 = scalar_lea.vmem %s3409_s7, %s2195_s19 }
  0x10   : > { %v2649_v4 = vld [vmem:[%s2768_s13] sm:$0xff]   ;;  %2383 = vmatprep.subr.bf16.mxu0 %v2644_v3  ;;  %2620 = vmatprep.subr.bf16.mxu1 %v2644_v3  ;;  %v2650_v10 = vld [vmem:[%s2768_s13 + $0x8] sm:$0xff]   ;;  %v2651_v11 = vld [vmem:[%s2768_s13 + $0x10] sm:$0xff]  }
  0x11   : > { %2393 = vmatprep.mubr.bf16.mxu0 %v2649_v4  ;;  %v2665_v9 = vld [vmem:[%s2768_s13 + $0x80] sm:$0xff]   ;;  %v2666_v12 = vld [vmem:[%s2768_s13 + $0x88] sm:$0xff]   ;;  %v2667_v13 = vld [vmem:[%s2768_s13 + $0x90] sm:$0xff]  }
  0x12   : > { %2425 = vmatprep.mubr.bf16.mxu1 %v2665_v9  ;;  %v2652_v14 = vld [vmem:[%s2768_s13 + $0x18] sm:$0xff]   ;;  %v2653_v15 = vld [vmem:[%s2768_s13 + $0x20] sm:$0xff]   ;;  %v2654_v20 = vld [vmem:[%s2768_s13 + $0x28] sm:$0xff]  }
  0x13   : > { %2384 = vmatpush3.bf16.msra.mxu0 %v2644_v3  ;;  %2628 = vmatpush3.bf16.msra.mxu1 %v2644_v3  ;;  %v2668_v16 = vld [vmem:[%s2768_s13 + $0x98] sm:$0xff]   ;;  %v2669_v17 = vld [vmem:[%s2768_s13 + $0xa0] sm:$0xff]   ;;  %v2670_v21 = vld [vmem:[%s2768_s13 + $0xa8] sm:$0xff]  }
  0x14   : > { %2385 = vmatprep.subr.bf16.mxu0 %v2645_v5  ;;  %2621 = vmatprep.subr.bf16.mxu1 %v2645_v5  ;;  %v2655_v22 = vld [vmem:[%s2768_s13 + $0x30] sm:$0xff]   ;;  %v2656_v26 = vld [vmem:[%s2768_s13 + $0x38] sm:$0xff]   ;;  %v2657_v28 = vld [vmem:[%s2768_s13 + $0x40] sm:$0xff]  }
  0x15   : > { %v2671_v23 = vld [vmem:[%s2768_s13 + $0xb0] sm:$0xff]   ;;  %v2672_v27 = vld [vmem:[%s2768_s13 + $0xb8] sm:$0xff]   ;;  %v2673_v29 = vld [vmem:[%s2768_s13 + $0xc0] sm:$0xff]  }
  0x16   : > { %v2658_v32 = vld [vmem:[%s2768_s13 + $0x48] sm:$0xff]   ;;  %v2659_v34 = vld [vmem:[%s2768_s13 + $0x50] sm:$0xff]   ;;  %v2660_v37 = vld [vmem:[%s2768_s13 + $0x58] sm:$0xff]  }
  0x17   : > { %2386 = vmatpush3.bf16.msra.mxu0 %v2645_v5  ;;  %2629 = vmatpush3.bf16.msra.mxu1 %v2645_v5  ;;  %v2674_v33 = vld [vmem:[%s2768_s13 + $0xc8] sm:$0xff]   ;;  %v2675_v35 = vld [vmem:[%s2768_s13 + $0xd0] sm:$0xff]   ;;  %v2676_v38 = vld [vmem:[%s2768_s13 + $0xd8] sm:$0xff]  }
  0x18   : > { %2387 = vmatprep.subr.bf16.mxu0 %v2646_v6  ;;  %2622 = vmatprep.subr.bf16.mxu1 %v2646_v6  ;;  %v2661_v39 = vld [vmem:[%s2768_s13 + $0x60] sm:$0xff]   ;;  %v2662_v41 = vld [vmem:[%s2768_s13 + $0x68] sm:$0xff]   ;;  %v2663_v43 = vld [vmem:[%s2768_s13 + $0x70] sm:$0xff]  }
  0x19   : > { %v2677_v40 = vld [vmem:[%s2768_s13 + $0xe0] sm:$0xff]   ;;  %v2678_v42 = vld [vmem:[%s2768_s13 + $0xe8] sm:$0xff]   ;;  %v2679_v44 = vld [vmem:[%s2768_s13 + $0xf0] sm:$0xff]  }
  0x1a   : > { %v2664_v45 = vld [vmem:[%s2768_s13 + $0x78] sm:$0xff]  }
  0x1b   : > { %2388 = vmatpush3.bf16.msra.mxu0 %v2646_v6  ;;  %2630 = vmatpush3.bf16.msra.mxu1 %v2646_v6  ;;  %v2680_v46 = vld [vmem:[%s2768_s13 + $0xf8] sm:$0xff]  }
  0x1c   : > { %2389 = vmatprep.subr.bf16.mxu0 %v2647_v7  ;;  %2623 = vmatprep.subr.bf16.mxu1 %v2647_v7 }
  0x1f   : > { %2390 = vmatpush3.bf16.msra.mxu0 %v2647_v7  ;;  %2631 = vmatpush3.bf16.msra.mxu1 %v2647_v7 }
  0x20   : > { %2391 = vmatprep.subr.bf16.mxu0 %v2648_v8  ;;  %2624 = vmatprep.subr.bf16.mxu1 %v2648_v8 }
  0x23   : > { %2392 = vmatpush3.bf16.msra.mxu0 %v2648_v8  ;;  %2632 = vmatpush3.bf16.msra.mxu1 %v2648_v8 }
  0x24   : > { %2457 = vmatprep.subr.bf16.mxu1 %v2681_v18  ;;  %2537 = vmatprep.subr.bf16.mxu0 %v2689_v63 }
  0x26   : > { %2394 = vmatmul.mubr.bf16.vlgmr.msra.gmra.mrb[0].mxu0 %v2650_v10  ;;  %2426 = vmatmul.mubr.bf16.vlgmr.msra.gmra.mrb[0].mxu1 %v2666_v12 }
  0x27   : > { %2397 = vmatprep.mubr.bf16.mxu0 %v2651_v11  ;;  %2429 = vmatprep.mubr.bf16.mxu1 %v2667_v13  ;;  %v2691_v13 = vld [vmem:[%s3407_s5 + $0x10] sm:$0xff]  }
  0x28   : > { %2458 = vmatpush3.bf16.msra.mxu1 %v2681_v18  ;;  %2538 = vmatpush3.bf16.msra.mxu0 %v2689_v63 }
  0x29   : > { %2459 = vmatprep.subr.bf16.mxu1 %v2682_v19  ;;  %2539 = vmatprep.subr.bf16.mxu0 %v2690_v1 }
  0x2c   : > { %2460 = vmatpush3.bf16.msra.mxu1 %v2682_v19  ;;  %2540 = vmatpush3.bf16.msra.mxu0 %v2690_v1 }
  0x2d   : > { %2461 = vmatprep.subr.bf16.mxu1 %v2683_v24  ;;  %2541 = vmatprep.subr.bf16.mxu0 %v2691_v13 }
  0x2e   : > { %2398 = vmatmul.mubr.bf16.gmra.mrb[4].mxu0 %v2652_v14  ;;  %2430 = vmatmul.mubr.bf16.gmra.mrb[4].mxu1 %v2668_v16 }
  0x2f   : > { %2401 = vmatprep.mubr.bf16.mxu0 %v2653_v15  ;;  %2433 = vmatprep.mubr.bf16.mxu1 %v2669_v17 }
  0x30   : > { %2462 = vmatpush3.bf16.msra.mxu1 %v2683_v24  ;;  %2542 = vmatpush3.bf16.msra.mxu0 %v2691_v13 }
  0x31   : > { %2463 = vmatprep.subr.bf16.mxu1 %v2684_v25 }
  0x34   : > { %2464 = vmatpush3.bf16.msra.mxu1 %v2684_v25 }
  0x35   : > { %2465 = vmatprep.subr.bf16.mxu1 %v2685_v30 }
  0x36   : > { %2402 = vmatmul.mubr.bf16.gmra.mrb[8].mxu0 %v2654_v20  ;;  %2434 = vmatmul.mubr.bf16.gmra.mrb[8].mxu1 %v2670_v21 }
  0x37   : > { %2405 = vmatprep.mubr.bf16.mxu0 %v2655_v22  ;;  %2437 = vmatprep.mubr.bf16.mxu1 %v2671_v23 }
  0x38   : > { %2466 = vmatpush3.bf16.msra.mxu1 %v2685_v30 }
  0x39   : > { %2467 = vmatprep.subr.bf16.mxu1 %v2686_v31 }
  0x3c   : > { %2468 = vmatpush3.bf16.msra.mxu1 %v2686_v31  ;;  %v2692_v31 = vld [vmem:[%s3407_s5 + $0x18] sm:$0xff]  }
  0x3d   : > { %2469 = vmatprep.subr.bf16.mxu1 %v2687_v36  ;;  %2543 = vmatprep.subr.bf16.mxu0 %v2692_v31 }
  0x3e   : > { %2406 = vmatmul.mubr.bf16.gmra.mrb[12].mxu0 %v2656_v26  ;;  %2438 = vmatmul.mubr.bf16.gmra.mrb[12].mxu1 %v2672_v27 }
  0x3f   : > { %2409 = vmatprep.mubr.bf16.mxu0 %v2657_v28  ;;  %2441 = vmatprep.mubr.bf16.mxu1 %v2673_v29 }
  0x40   : > { %2470 = vmatpush3.bf16.msra.mxu1 %v2687_v36  ;;  %2544 = vmatpush3.bf16.msra.mxu0 %v2692_v31 }
  0x41   : > { %2471 = vmatprep.subr.bf16.mxu1 %v2688_v47 }
  0x44   : > { %2472 = vmatpush3.bf16.msra.mxu1 %v2688_v47 }
  0x46   : > { %2410 = vmatmul.mubr.bf16.gmra.mrb[16].mxu0 %v2658_v32  ;;  %2442 = vmatmul.mubr.bf16.gmra.mrb[16].mxu1 %v2674_v33 }
  0x47   : > { %2413 = vmatprep.mubr.bf16.mxu0 %v2659_v34  ;;  %2445 = vmatprep.mubr.bf16.mxu1 %v2675_v35 }
  0x4e   : > { %2414 = vmatmul.mubr.bf16.gmra.mrb[20].mxu0 %v2660_v37  ;;  %2446 = vmatmul.mubr.bf16.gmra.mrb[20].mxu1 %v2676_v38 }
  0x4f   : > { %2417 = vmatprep.mubr.bf16.mxu0 %v2661_v39  ;;  %2449 = vmatprep.mubr.bf16.mxu1 %v2677_v40 }
  0x56   : > { %2418 = vmatmul.mubr.bf16.gmra.mrb[24].mxu0 %v2662_v41  ;;  %2450 = vmatmul.mubr.bf16.gmra.mrb[24].mxu1 %v2678_v42 }
  0x57   : > { %2421 = vmatprep.mubr.bf16.mxu0 %v2663_v43  ;;  %2453 = vmatprep.mubr.bf16.mxu1 %v2679_v44 }
  0x5e   : > { %2422 = vmatmul.mubr.bf16.gmra.mrb[28].mxu0 %v2664_v45  ;;  %2454 = vmatmul.mubr.bf16.gmra.mrb[28].mxu1 %v2680_v46  ;;  %v2693_v46 = vld [vmem:[%s3407_s5 + $0x20] sm:$0xff]  }
  0x5f   : > { %2545 = vmatprep.subr.bf16.mxu0 %v2693_v46 }
  0x60   : > { %2546 = vmatpush3.bf16.msra.mxu0 %v2693_v46 }
  0xf9   : > { %v2395_v49 = vpop.f32.mrb[0].mxu0  ;;  %v2427_v50 = vpop.f32.mrb[0].mxu1 }
  0xfa   : > { %v653_v51 = vadd.f32 %v2395_v49, %v2844_v48  ;;  %v644_v52 = vpop.f32.mrb[1].mxu0  ;;  %v772_v53 = vpop.f32.mrb[1].mxu1  ;;  %v2857_v3 = vadd.f32 %v2427_v50, %v2844_v48 }
  0xfb   : > { %v645_v54 = vadd.f32 %v2844_v48, %v644_v52  ;;  %v2396_v55 = vpop.f32.mrb[2].mxu0  ;;  %v2428_v56 = vpop.f32.mrb[2].mxu1  ;;  %v773_v4 = vadd.f32 %v2844_v48, %v772_v53 }
  0xfc   : > { %v965_v57 = vmul.f32 0.2, %v653_v51  ;;  %v656_v58 = vadd.f32 %v2396_v55, %v2844_v48  ;;  %v647_v59 = vpop.f32.mrb[3].mxu0  ;;  %v775_v60 = vpop.f32.mrb[3].mxu1  ;;  %vm901_vm0 = vcmp.gt.f32.partialorder %v653_v51, 0.0  ;;  %vm933_vm4 = vcmp.gt.f32.partialorder %v2857_v3, 0.0 }
  0xfd   : > { %v963_v61 = vmul.f32 0.2, %v645_v54  ;;  %v648_v62 = vadd.f32 %v2844_v48, %v647_v59  ;;  %vm899_vm1 = vcmp.gt.f32.partialorder %v645_v54, 0.0  ;;  %v776_v11 = vadd.f32 %v2844_v48, %v775_v60 }
  0xfe   : > { %vm902_vm2 = vcmp.gt.f32.partialorder %v656_v58, 0.0  ;;  %v966_v0 = vmul.f32 0.2, %v656_v58  ;;  %v1029_v5 = vsel %vm901_vm0, %v653_v51, %v965_v57  ;;  %v997_v20 = vmul.f32 0.2, %v2857_v3 }
  0xff   : > { %vm900_vm3 = vcmp.gt.f32.partialorder %v648_v62, 0.0  ;;  %v964_v2 = vmul.f32 0.2, %v648_v62  ;;  %v1027_v9 = vsel %vm899_vm1, %v645_v54, %v963_v61  ;;  %vm931_vm5 = vcmp.gt.f32.partialorder %v773_v4, 0.0 }
 0x100   : > { %v1030_v6 = vsel %vm902_vm2, %v656_v58, %v966_v0  ;;  %v995_v25 = vmul.f32 0.2, %v773_v4  ;;  %v784_v26 = vadd.f32 %v2428_v56, %v2844_v48  ;;  %v996_v30 = vmul.f32 0.2, %v776_v11 }
 0x101   : > { %v1092_v7 = vpack.c.bf16 %v1030_v6, %v1029_v5  ;;  %v2399_v8 = vpop.f32.mrb[4].mxu0  ;;  %v1028_v10 = vsel %vm900_vm3, %v648_v62, %v964_v2  ;;  %v2431_v12 = vpop.f32.mrb[4].mxu1  ;;  %vm932_vm9 = vcmp.gt.f32.partialorder %v776_v11, 0.0  ;;  %v2904_v62 = vsel %vm933_vm4, %v2857_v3, %v997_v20 }
 0x102   : > { %v669_v14 = vadd.f32 %v2399_v8, %v2844_v48  ;;  %v660_v15 = vpop.f32.mrb[5].mxu0  ;;  %v1091_v16 = vpack.c.bf16 %v1028_v10, %v1027_v9  ;;  %v788_v17 = vpop.f32.mrb[5].mxu1  ;;  %v2877_v34 = vadd.f32 %v2431_v12, %v2844_v48  ;;  %v998_v38 = vmul.f32 0.2, %v784_v26 }
 0x103   : > { %v661_v18 = vadd.f32 %v2844_v48, %v660_v15  ;;  %v2400_v19 = vpop.f32.mrb[6].mxu0  ;;  %v2868_v21 = vpop.f32.mrb[6].mxu1  ;;  %v2880_v35 = vadd.f32 %v2844_v48, %v788_v17  ;;  %v2883_v39 = vsel %vm931_vm5, %v773_v4, %v995_v25  ;;  %v2885_v44 = vsel %vm932_vm9, %v776_v11, %v996_v30  ;;  %v2694_v4 = vld [vmem:[%s3407_s5 + $0x28] sm:$0xff]  }
 0x104   : > { %v969_v22 = vmul.f32 0.2, %v669_v14  ;;  %v672_v23 = vadd.f32 %v2400_v19, %v2844_v48  ;;  %v663_v24 = vpop.f32.mrb[7].mxu0  ;;  %2473 = vmatprep.mubr.bf16.mxu1 %v1091_v16  ;;  %v791_v27 = vpop.f32.mrb[7].mxu1  ;;  %vm905_vm6 = vcmp.gt.f32.partialorder %v669_v14, 0.0  ;;  %vm934_vm11 = vcmp.gt.f32.partialorder %v784_v26, 0.0  ;;  %2547 = vmatprep.subr.bf16.mxu0 %v2694_v4 }
 0x105   : > { %v967_v28 = vmul.f32 0.2, %v661_v18  ;;  %v664_v29 = vadd.f32 %v2844_v48, %v663_v24  ;;  %2474 = vmatmul.mubr.bf16.vlgmr.msra.gmra.mrb[32].mxu1 %v1092_v7  ;;  %vm903_vm7 = vcmp.gt.f32.partialorder %v661_v18, 0.0  ;;  %v792_v51 = vadd.f32 %v2844_v48, %v791_v27  ;;  %2548 = vmatpush3.bf16.msra.mxu0 %v2694_v4 }
 0x106   : > { %vm906_vm8 = vcmp.gt.f32.partialorder %v672_v23, 0.0  ;;  %v970_v32 = vmul.f32 0.2, %v672_v23  ;;  %v1033_v36 = vsel %vm905_vm6, %v669_v14, %v969_v22  ;;  %v2894_v55 = vmul.f32 0.2, %v2877_v34 }
 0x107   : > { %vm904_vm10 = vcmp.gt.f32.partialorder %v664_v29, 0.0  ;;  %v968_v33 = vmul.f32 0.2, %v664_v29  ;;  %v1031_v41 = vsel %vm903_vm7, %v661_v18, %v967_v28  ;;  %vm935_vm12 = vcmp.gt.f32.partialorder %v2880_v35, 0.0  ;;  %v2695_v18 = vld [vmem:[%s3407_s5 + $0x30] sm:$0xff]  }
 0x108   : > { %v1034_v37 = vsel %vm906_vm8, %v672_v23, %v970_v32  ;;  %v1107_v56 = vpack.c.bf16 %v2885_v44, %v2883_v39  ;;  %v999_v61 = vmul.f32 0.2, %v2880_v35  ;;  %vm937_vm14 = vcmp.gt.f32.partialorder %v2877_v34, 0.0  ;;  %2549 = vmatprep.subr.bf16.mxu0 %v2695_v18 }
 0x109   : > { %v2403_v40 = vpop.f32.mrb[8].mxu0  ;;  %v1032_v42 = vsel %vm904_vm10, %v664_v29, %v968_v33  ;;  %v1094_v43 = vpack.c.bf16 %v1034_v37, %v1033_v36  ;;  %v2435_v45 = vpop.f32.mrb[8].mxu1  ;;  %v2909_v2 = vsel %vm934_vm11, %v784_v26, %v998_v38  ;;  %v1000_v5 = vmul.f32 0.2, %v792_v51  ;;  %2550 = vmatpush3.bf16.msra.mxu0 %v2695_v18 }
 0x10a   : > { %v685_v47 = vadd.f32 %v2403_v40, %v2844_v48  ;;  %v676_v49 = vpop.f32.mrb[9].mxu0  ;;  %v1093_v50 = vpack.c.bf16 %v1032_v42, %v1031_v41  ;;  %v804_v52 = vpop.f32.mrb[9].mxu1  ;;  %v2916_v7 = vadd.f32 %v2868_v21, %v2844_v48  ;;  %vm936_vm2 = vcmp.gt.f32.partialorder %v792_v51, 0.0 }
 0x10b   : > { %v677_v53 = vadd.f32 %v2844_v48, %v676_v49  ;;  %v2404_v54 = vpop.f32.mrb[10].mxu0  ;;  %v2436_v57 = vpop.f32.mrb[10].mxu1  ;;  %v2920_v10 = vadd.f32 %v2435_v45, %v2844_v48  ;;  %v1108_v11 = vpack.c.bf16 %v2909_v2, %v2904_v62  ;;  %v2925_v16 = vadd.f32 %v2844_v48, %v804_v52  ;;  %v2696_v2 = vld [vmem:[%s3407_s5 + $0x38] sm:$0xff]  }
 0x10c   : > { %v973_v58 = vmul.f32 0.2, %v685_v47  ;;  %v688_v59 = vadd.f32 %v2404_v54, %v2844_v48  ;;  %v679_v60 = vpop.f32.mrb[11].mxu0  ;;  %2477 = vmatprep.mubr.bf16.mxu1 %v1093_v50  ;;  %v807_v63 = vpop.f32.mrb[11].mxu1  ;;  %vm909_vm13 = vcmp.gt.f32.partialorder %v685_v47, 0.0  ;;  %v2934_v22 = vsel %vm935_vm12, %v2880_v35, %v999_v61  ;;  %2551 = vmatprep.subr.bf16.mxu0 %v2696_v2 }
 0x10d   : > { %v971_v0 = vmul.f32 0.2, %v677_v53  ;;  %v680_v1 = vadd.f32 %v2844_v48, %v679_v60  ;;  %2478 = vmatmul.mubr.bf16.gmra.mrb[36].mxu1 %v1094_v43  ;;  %vm907_vm15 = vcmp.gt.f32.partialorder %v677_v53, 0.0  ;;  %v2937_v23 = vsel %vm936_vm2, %v792_v51, %v1000_v5  ;;  %2552 = vmatpush3.bf16.msra.mxu0 %v2696_v2 }
 0x10e   : > { %vm910_vm0 = vcmp.gt.f32.partialorder %v688_v59, 0.0  ;;  %v974_v3 = vmul.f32 0.2, %v688_v59  ;;  %v1037_v8 = vsel %vm909_vm13, %v685_v47, %v973_v58  ;;  %vm938_vm3 = vcmp.gt.f32.partialorder %v2916_v7, 0.0 }
 0x10f   : > { %vm908_vm1 = vcmp.gt.f32.partialorder %v680_v1, 0.0  ;;  %v972_v6 = vmul.f32 0.2, %v680_v1  ;;  %v1035_v13 = vsel %vm907_vm15, %v677_v53, %v971_v0  ;;  %v1002_v27 = vmul.f32 0.2, %v2916_v7 }
 0x110   : > { %v1038_v9 = vsel %vm910_vm0, %v688_v59, %v974_v3  ;;  %v2943_v28 = vadd.f32 %v2436_v57, %v2844_v48  ;;  %v2947_v33 = vmul.f32 0.2, %v2920_v10  ;;  %v2950_v35 = vadd.f32 %v2844_v48, %v807_v63 }
 0x111   : > { %v2407_v12 = vpop.f32.mrb[12].mxu0  ;;  %v1036_v14 = vsel %vm908_vm1, %v680_v1, %v972_v6  ;;  %v1096_v15 = vpack.c.bf16 %v1038_v9, %v1037_v8  ;;  %v2439_v17 = vpop.f32.mrb[12].mxu1  ;;  %v1109_v38 = vpack.c.bf16 %v2937_v23, %v2934_v22  ;;  %vm941_vm7 = vcmp.gt.f32.partialorder %v2920_v10, 0.0 }
 0x112   : > { %v701_v19 = vadd.f32 %v2407_v12, %v2844_v48  ;;  %v692_v20 = vpop.f32.mrb[13].mxu0  ;;  %v1095_v21 = vpack.c.bf16 %v1036_v14, %v1035_v13  ;;  %v820_v24 = vpop.f32.mrb[13].mxu1  ;;  %v1003_v42 = vmul.f32 0.2, %v2925_v16  ;;  %vm939_vm9 = vcmp.gt.f32.partialorder %v2925_v16, 0.0 }
 0x113   : > { %v693_v25 = vadd.f32 %v2844_v48, %v692_v20  ;;  %v2408_v26 = vpop.f32.mrb[14].mxu0  ;;  %v2440_v29 = vpop.f32.mrb[14].mxu1  ;;  %v2959_v45 = vmul.f32 0.2, %v2943_v28  ;;  %vm942_vm10 = vcmp.gt.f32.partialorder %v2943_v28, 0.0  ;;  %v2964_v49 = vadd.f32 %v2439_v17, %v2844_v48 }
 0x114   : > { %v977_v30 = vmul.f32 0.2, %v701_v19  ;;  %v704_v31 = vadd.f32 %v2408_v26, %v2844_v48  ;;  %v695_v32 = vpop.f32.mrb[15].mxu0  ;;  %2481 = vmatprep.mubr.bf16.mxu1 %v1095_v21  ;;  %vm913_vm4 = vcmp.gt.f32.partialorder %v701_v19, 0.0  ;;  %v823_v40 = vpop.f32.mrb[15].mxu1  ;;  %v2970_v50 = vsel %vm937_vm14, %v2877_v34, %v2894_v55 }
 0x115   : > { %v975_v36 = vmul.f32 0.2, %v693_v25  ;;  %v696_v37 = vadd.f32 %v2844_v48, %v695_v32  ;;  %2482 = vmatmul.mubr.bf16.gmra.mrb[40].mxu1 %v1096_v15  ;;  %vm911_vm5 = vcmp.gt.f32.partialorder %v693_v25, 0.0  ;;  %vm940_vm11 = vcmp.gt.f32.partialorder %v2950_v35, 0.0 }
 0x116   : > { %vm914_vm6 = vcmp.gt.f32.partialorder %v704_v31, 0.0  ;;  %v978_v41 = vmul.f32 0.2, %v704_v31  ;;  %v1041_v46 = vsel %vm913_vm4, %v701_v19, %v977_v30  ;;  %v2976_v61 = vadd.f32 %v2844_v48, %v820_v24 }
 0x117   : > { %vm912_vm8 = vcmp.gt.f32.partialorder %v696_v37, 0.0  ;;  %v976_v43 = vmul.f32 0.2, %v696_v37  ;;  %v1039_v52 = vsel %vm911_vm5, %v693_v25, %v975_v36  ;;  %v2981_v34 = vsel %vm938_vm3, %v2916_v7, %v1002_v27 }
 0x118   : > { %v1042_v47 = vsel %vm914_vm6, %v704_v31, %v978_v41  ;;  %v1004_v1 = vmul.f32 0.2, %v2950_v35  ;;  %v1110_v4 = vpack.c.bf16 %v2981_v34, %v2970_v50  ;;  %v2988_v3 = vadd.f32 %v2440_v29, %v2844_v48 }
 0x119   : > { %v2411_v51 = vpop.f32.mrb[16].mxu0  ;;  %v1040_v53 = vsel %vm912_vm8, %v696_v37, %v976_v43  ;;  %v1098_v54 = vpack.c.bf16 %v1042_v47, %v1041_v46  ;;  %v2443_v57 = vpop.f32.mrb[16].mxu1  ;;  %v2992_v7 = vmul.f32 0.2, %v2964_v49  ;;  %vm943_vm15 = vcmp.gt.f32.partialorder %v2976_v61, 0.0 }
 0x11a   : > { %v717_v58 = vadd.f32 %v2411_v51, %v2844_v48  ;;  %v708_v59 = vpop.f32.mrb[17].mxu0  ;;  %v1097_v60 = vpack.c.bf16 %v1040_v53, %v1039_v52  ;;  %v836_v55 = vpop.f32.mrb[17].mxu1  ;;  %v1007_v17 = vmul.f32 0.2, %v2976_v61  ;;  %v3000_v18 = vsel %vm939_vm9, %v2925_v16, %v1003_v42 }
 0x11b   : > { %v709_v63 = vadd.f32 %v2844_v48, %v708_v59  ;;  %v2412_v0 = vpop.f32.mrb[18].mxu0  ;;  %v2444_v5 = vpop.f32.mrb[18].mxu1  ;;  %v3003_v20 = vmul.f32 0.2, %v2988_v3  ;;  %v824_v21 = vadd.f32 %v2844_v48, %v823_v40  ;;  %v3009_v27 = vsel %vm940_vm11, %v2950_v35, %v1004_v1 }
 0x11c   : > { %v981_v6 = vmul.f32 0.2, %v717_v58  ;;  %v720_v8 = vadd.f32 %v2412_v0, %v2844_v48  ;;  %v711_v9 = vpop.f32.mrb[19].mxu0  ;;  %2485 = vmatprep.mubr.bf16.mxu1 %v1097_v60  ;;  %v839_v12 = vpop.f32.mrb[19].mxu1  ;;  %vm917_vm12 = vcmp.gt.f32.partialorder %v717_v58, 0.0  ;;  %vm945_vm1 = vcmp.gt.f32.partialorder %v2964_v49, 0.0 }
 0x11d   : > { %vm915_vm13 = vcmp.gt.f32.partialorder %v709_v63, 0.0  ;;  %v979_v13 = vmul.f32 0.2, %v709_v63  ;;  %v712_v14 = vadd.f32 %v2844_v48, %v711_v9  ;;  %2486 = vmatmul.mubr.bf16.gmra.mrb[44].mxu1 %v1098_v54  ;;  %v1111_v16 = vpack.c.bf16 %v3009_v27, %v3000_v18 }
 0x11e   : > { %vm918_vm14 = vcmp.gt.f32.partialorder %v720_v8, 0.0  ;;  %v982_v15 = vmul.f32 0.2, %v720_v8  ;;  %v1045_v25 = vsel %vm917_vm12, %v717_v58, %v981_v6  ;;  %v3018_v32 = vsel %vm941_vm7, %v2920_v10, %v2947_v33 }
 0x11f   : > { %vm916_vm0 = vcmp.gt.f32.partialorder %v712_v14, 0.0  ;;  %v980_v19 = vmul.f32 0.2, %v712_v14  ;;  %v1043_v24 = vsel %vm915_vm13, %v709_v63, %v979_v13  ;;  %vm946_vm2 = vcmp.gt.f32.partialorder %v2988_v3, 0.0 }
 0x120   : > { %v1046_v26 = vsel %vm918_vm14, %v720_v8, %v982_v15  ;;  %v3023_v41 = vadd.f32 %v2443_v57, %v2844_v48  ;;  %v3026_v42 = vadd.f32 %v2844_v48, %v836_v55  ;;  %vm944_vm3 = vcmp.gt.f32.partialorder %v824_v21, 0.0 }
 0x121   : > { %v2415_v29 = vpop.f32.mrb[20].mxu0  ;;  %v1044_v30 = vsel %vm916_vm0, %v712_v14, %v980_v19  ;;  %v1100_v31 = vpack.c.bf16 %v1046_v26, %v1045_v25  ;;  %v2447_v36 = vpop.f32.mrb[20].mxu1  ;;  %v1008_v10 = vmul.f32 0.2, %v824_v21  ;;  %v3033_v33 = vsel %vm942_vm10, %v2943_v28, %v2959_v45 }
 0x122   : > { %v733_v37 = vadd.f32 %v2415_v29, %v2844_v48  ;;  %v724_v40 = vpop.f32.mrb[21].mxu0  ;;  %v1099_v35 = vpack.c.bf16 %v1044_v30, %v1043_v24  ;;  %v852_v43 = vpop.f32.mrb[21].mxu1  ;;  %v1112_v57 = vpack.c.bf16 %v3033_v33, %v3018_v32  ;;  %v3042_v28 = vadd.f32 %v2444_v5, %v2844_v48 }
 0x123   : > { %v725_v46 = vadd.f32 %v2844_v48, %v724_v40  ;;  %v2416_v47 = vpop.f32.mrb[22].mxu0  ;;  %v3035_v51 = vpop.f32.mrb[22].mxu1  ;;  %v3045_v55 = vmul.f32 0.2, %v3023_v41  ;;  %vm947_vm7 = vcmp.gt.f32.partialorder %v3026_v42, 0.0  ;;  %v840_v1 = vadd.f32 %v2844_v48, %v839_v12 }
 0x124   : > { %vm921_vm4 = vcmp.gt.f32.partialorder %v733_v37, 0.0  ;;  %v985_v52 = vmul.f32 0.2, %v733_v37  ;;  %v736_v53 = vadd.f32 %v2416_v47, %v2844_v48  ;;  %v727_v54 = vpop.f32.mrb[23].mxu0  ;;  %2489 = vmatprep.mubr.bf16.mxu1 %v1099_v35  ;;  %v855_v58 = vpop.f32.mrb[23].mxu1  ;;  %v3057_v19 = vsel %vm943_vm15, %v2976_v61, %v1007_v17 }
 0x125   : > { %vm919_vm5 = vcmp.gt.f32.partialorder %v725_v46, 0.0  ;;  %v983_v59 = vmul.f32 0.2, %v725_v46  ;;  %v728_v60 = vadd.f32 %v2844_v48, %v727_v54  ;;  %2490 = vmatmul.mubr.bf16.gmra.mrb[48].mxu1 %v1100_v31  ;;  %v1011_v0 = vmul.f32 0.2, %v3026_v42 }
 0x126   : > { %vm922_vm6 = vcmp.gt.f32.partialorder %v736_v53, 0.0  ;;  %v986_v45 = vmul.f32 0.2, %v736_v53  ;;  %v1049_v8 = vsel %vm921_vm4, %v733_v37, %v985_v52  ;;  %v3052_v5 = vmul.f32 0.2, %v3042_v28 }
 0x127   : > { %vm920_vm8 = vcmp.gt.f32.partialorder %v728_v60, 0.0  ;;  %v984_v63 = vmul.f32 0.2, %v728_v60  ;;  %v1047_v6 = vsel %vm919_vm5, %v725_v46, %v983_v59  ;;  %v3060_v24 = vsel %vm944_vm3, %v824_v21, %v1008_v10 }
 0x128   : > { %v1050_v9 = vsel %vm922_vm6, %v736_v53, %v986_v45  ;;  %v1113_v30 = vpack.c.bf16 %v3060_v24, %v3057_v19  ;;  %v3068_v31 = vadd.f32 %v2447_v36, %v2844_v48  ;;  %vm948_vm9 = vcmp.gt.f32.partialorder %v840_v1, 0.0 }
 0x129   : > { %v2419_v13 = vpop.f32.mrb[24].mxu0  ;;  %v1048_v14 = vsel %vm920_vm8, %v728_v60, %v984_v63  ;;  %v1102_v15 = vpack.c.bf16 %v1050_v9, %v1049_v8  ;;  %v3062_v25 = vpop.f32.mrb[24].mxu1  ;;  %v1012_v21 = vmul.f32 0.2, %v840_v1  ;;  %v3074_v40 = vadd.f32 %v2844_v48, %v852_v43 }
 0x12a   : > { %v749_v12 = vadd.f32 %v2419_v13, %v2844_v48  ;;  %v740_v26 = vpop.f32.mrb[25].mxu0  ;;  %v1101_v29 = vpack.c.bf16 %v1048_v14, %v1047_v6  ;;  %v3070_v37 = vpop.f32.mrb[25].mxu1  ;;  %v3083_v36 = vsel %vm945_vm1, %v2964_v49, %v2992_v7  ;;  %vm949_vm12 = vcmp.gt.f32.partialorder %v3023_v41, 0.0 }
 0x12b   : > { %v741_v61 = vadd.f32 %v2844_v48, %v740_v26  ;;  %v2420_v17 = vpop.f32.mrb[26].mxu0  ;;  %v3076_v35 = vpop.f32.mrb[26].mxu1  ;;  %v3093_v54 = vsel %vm946_vm2, %v2988_v3, %v3003_v20  ;;  %vm950_vm14 = vcmp.gt.f32.partialorder %v3042_v28, 0.0  ;;  %v3097_v49 = vmul.f32 0.2, %v3068_v31 }
 0x12c   : > { %vm925_vm10 = vcmp.gt.f32.partialorder %v749_v12, 0.0  ;;  %v989_v46 = vmul.f32 0.2, %v749_v12  ;;  %v752_v47 = vadd.f32 %v2420_v17, %v2844_v48  ;;  %v743_v10 = vpop.f32.mrb[27].mxu0  ;;  %2493 = vmatprep.mubr.bf16.mxu1 %v1101_v29  ;;  %v3085_v52 = vpop.f32.mrb[27].mxu1  ;;  %vm951_vm0 = vcmp.gt.f32.partialorder %v3074_v40, 0.0 }
 0x12d   : > { %vm923_vm11 = vcmp.gt.f32.partialorder %v741_v61, 0.0  ;;  %v987_v53 = vmul.f32 0.2, %v741_v61  ;;  %v744_v43 = vadd.f32 %v2844_v48, %v743_v10  ;;  %2494 = vmatmul.mubr.bf16.gmra.mrb[52].mxu1 %v1102_v15  ;;  %v1015_v63 = vmul.f32 0.2, %v3074_v40 }
 0x12e   : > { %vm926_vm13 = vcmp.gt.f32.partialorder %v752_v47, 0.0  ;;  %v990_v59 = vmul.f32 0.2, %v752_v47  ;;  %v1053_v60 = vsel %vm925_vm10, %v749_v12, %v989_v46  ;;  %v1114_v3 = vpack.c.bf16 %v3093_v54, %v3083_v36 }
 0x12f   : > { %vm924_vm15 = vcmp.gt.f32.partialorder %v744_v43, 0.0  ;;  %v988_v7 = vmul.f32 0.2, %v744_v43  ;;  %v1051_v45 = vsel %vm923_vm11, %v741_v61, %v987_v53  ;;  %v3105_v20 = vadd.f32 %v3035_v51, %v2844_v48 }
 0x130   : > { %v1054_v6 = vsel %vm926_vm13, %v752_v47, %v990_v59  ;;  %v856_v8 = vadd.f32 %v2844_v48, %v855_v58  ;;  %v3111_v15 = vsel %vm947_vm7, %v3026_v42, %v1011_v0  ;;  %v3114_v12 = vsel %vm948_vm9, %v840_v1, %v1012_v21 }
 0x131   : > { %v2423_v9 = vpop.f32.mrb[28].mxu0  ;;  %v1052_v13 = vsel %vm924_vm15, %v744_v43, %v988_v7  ;;  %v1104_v14 = vpack.c.bf16 %v1054_v6, %v1053_v60  ;;  %v2455_v26 = vpop.f32.mrb[28].mxu1  ;;  %vm953_vm1 = vcmp.gt.f32.partialorder %v3068_v31, 0.0  ;;  %vm954_vm2 = vcmp.gt.f32.partialorder %v3105_v20, 0.0 }
 0x132   : > { %v765_v29 = vadd.f32 %v2423_v9, %v2844_v48  ;;  %v756_v61 = vpop.f32.mrb[29].mxu0  ;;  %v1103_v17 = vpack.c.bf16 %v1052_v13, %v1051_v45  ;;  %v1018_v51 = vmul.f32 0.2, %v3105_v20  ;;  %v884_v58 = vpop.f32.mrb[29].mxu1  ;;  %vm952_vm3 = vcmp.gt.f32.partialorder %v856_v8, 0.0 }
 0x133   : > { %v757_v46 = vadd.f32 %v2844_v48, %v756_v61  ;;  %v2424_v47 = vpop.f32.mrb[30].mxu0  ;;  %v1016_v42 = vmul.f32 0.2, %v856_v8  ;;  %v2456_v1 = vpop.f32.mrb[30].mxu1  ;;  %v877_v43 = vadd.f32 %v3062_v25, %v2844_v48  ;;  %v869_v45 = vadd.f32 %v2844_v48, %v3070_v37 }
 0x134   : > { %vm929_vm4 = vcmp.gt.f32.partialorder %v765_v29, 0.0  ;;  %v993_v21 = vmul.f32 0.2, %v765_v29  ;;  %v768_v10 = vadd.f32 %v2424_v47, %v2844_v48  ;;  %v759_v53 = vpop.f32.mrb[31].mxu0  ;;  %2497 = vmatprep.mubr.bf16.mxu1 %v1103_v17  ;;  %v887_v59 = vpop.f32.mrb[31].mxu1  ;;  %v1078_v37 = vsel %vm950_vm14, %v3042_v28, %v3052_v5 }
 0x135   : > { %vm927_vm5 = vcmp.gt.f32.partialorder %v757_v46, 0.0  ;;  %v991_v60 = vmul.f32 0.2, %v757_v46  ;;  %v760_v7 = vadd.f32 %v2844_v48, %v759_v53  ;;  %2498 = vmatmul.mubr.bf16.gmra.mrb[56].mxu1 %v1104_v14  ;;  %vm957_vm7 = vcmp.gt.f32.partialorder %v877_v43, 0.0 }
 0x136   : > { %vm930_vm6 = vcmp.gt.f32.partialorder %v768_v10, 0.0  ;;  %v994_v6 = vmul.f32 0.2, %v768_v10  ;;  %v1057_v9 = vsel %vm929_vm4, %v765_v29, %v993_v21  ;;  %v1021_v17 = vmul.f32 0.2, %v877_v43 }
 0x137   : > { %vm928_vm8 = vcmp.gt.f32.partialorder %v760_v7, 0.0  ;;  %v992_v13 = vmul.f32 0.2, %v760_v7  ;;  %v1055_v61 = vsel %vm927_vm5, %v757_v46, %v991_v60  ;;  %vm955_vm9 = vcmp.gt.f32.partialorder %v869_v45, 0.0 }
 0x138   : > { %v1058_v47 = vsel %vm930_vm6, %v768_v10, %v994_v6  ;;  %v1019_v25 = vmul.f32 0.2, %v869_v45  ;;  %v1077_v53 = vsel %vm949_vm12, %v3023_v41, %v3045_v55  ;;  %v880_v29 = vadd.f32 %v3076_v35, %v2844_v48 }
 0x139   : > { %v1056_v14 = vsel %vm928_vm8, %v760_v7, %v992_v13  ;;  %v1106_v0 = vpack.c.bf16 %v1058_v47, %v1057_v9  ;;  %v1116_v21 = vpack.c.bf16 %v1078_v37, %v1077_v53  ;;  %v872_v10 = vadd.f32 %v2844_v48, %v3085_v52 }
 0x13a   : > { %v1105_v46 = vpack.c.bf16 %v1056_v14, %v1055_v61  ;;  %v1079_v60 = vsel %vm951_vm0, %v3074_v40, %v1015_v63  ;;  %vm958_vm10 = vcmp.gt.f32.partialorder %v880_v29, 0.0  ;;  %v1022_v41 = vmul.f32 0.2, %v880_v29 }
 0x13b   : > { %v1080_v55 = vsel %vm952_vm3, %v856_v8, %v1016_v42  ;;  %v893_v7 = vadd.f32 %v2455_v26, %v2844_v48  ;;  %vm956_vm11 = vcmp.gt.f32.partialorder %v872_v10, 0.0  ;;  %v1020_v28 = vmul.f32 0.2, %v872_v10 }
 0x13c   : > { %2501 = vmatprep.mubr.bf16.mxu1 %v1105_v46  ;;  %v1117_v5 = vpack.c.bf16 %v1080_v55, %v1079_v60  ;;  %v885_v35 = vadd.f32 %v2844_v48, %v884_v58  ;;  %v1081_v40 = vsel %vm953_vm1, %v3068_v31, %v3097_v49  ;;  %v1082_v52 = vsel %vm954_vm2, %v3105_v20, %v1018_v51 }
 0x13d   : > { %2502 = vmatmul.mubr.bf16.gmra.mrb[60].mxu1 %v1106_v0  ;;  %vm961_vm12 = vcmp.gt.f32.partialorder %v893_v7, 0.0  ;;  %v1025_v6 = vmul.f32 0.2, %v893_v7  ;;  %v1118_v8 = vpack.c.bf16 %v1082_v52, %v1081_v40  ;;  %v896_v26 = vadd.f32 %v2456_v1, %v2844_v48 }
 0x13e   : > { %2505 = vmatprep.mubr.bf16.mxu1 %v1107_v56  ;;  %vm959_vm13 = vcmp.gt.f32.partialorder %v885_v35, 0.0  ;;  %v1023_v63 = vmul.f32 0.2, %v885_v35  ;;  %v888_v58 = vadd.f32 %v2844_v48, %v887_v59  ;;  %v1083_v42 = vsel %vm955_vm9, %v869_v45, %v1019_v25 }
 0x13f   : > { %v1084_v0 = vsel %vm956_vm11, %v872_v10, %v1020_v28  ;;  %v1085_v31 = vsel %vm957_vm7, %v877_v43, %v1021_v17  ;;  %vm962_vm14 = vcmp.gt.f32.partialorder %v896_v26, 0.0  ;;  %v1026_v49 = vmul.f32 0.2, %v896_v26 }
 0x140   : > { %v1119_v20 = vpack.c.bf16 %v1084_v0, %v1083_v42  ;;  %v1086_v51 = vsel %vm958_vm10, %v880_v29, %v1022_v41  ;;  %vm960_vm15 = vcmp.gt.f32.partialorder %v888_v58, 0.0  ;;  %v1024_v39 = vmul.f32 0.2, %v888_v58 }
 0x141   : > { %v1120_v44 = vpack.c.bf16 %v1086_v51, %v1085_v31  ;;  %v1087_v56 = vsel %vm959_vm13, %v885_v35, %v1023_v63  ;;  %v1089_v9 = vsel %vm961_vm12, %v893_v7, %v1025_v6  ;;  %v1090_v1 = vsel %vm962_vm14, %v896_v26, %v1026_v49 }
 0x142   : > { %v1088_v13 = vsel %vm960_vm15, %v888_v58, %v1024_v39  ;;  %v1122_v48 = vpack.c.bf16 %v1090_v1, %v1089_v9  ;;  %v3410_v62 = vpack.c.bf16 %v3114_v12, %v3111_v15 }
 0x143   : > { %v1121_v59 = vpack.c.bf16 %v1088_v13, %v1087_v56 }
 0x145   : > { %2506 = vmatmul.mubr.bf16.gmra.mrb[64].mxu1 %v1108_v11  ;;  %v3194_v11 = vld [vmem:[%s3406_s4] ss:$0 sm:$0xff] }
 0x146   : > { %2509 = vmatprep.mubr.bf16.mxu1 %v1109_v38 }
 0x14d   : > { %2510 = vmatmul.mubr.bf16.gmra.mrb[68].mxu1 %v1110_v4 }
 0x14e   : > { %2513 = vmatprep.mubr.bf16.mxu1 %v1111_v16 }
 0x155   : > { %2514 = vmatmul.mubr.bf16.gmra.mrb[72].mxu1 %v1112_v57 }
 0x156   : > { %2517 = vmatprep.mubr.bf16.mxu1 %v1113_v30 }
 0x15d   : > { %2518 = vmatmul.mubr.bf16.gmra.mrb[76].mxu1 %v1114_v3 }
 0x15e   : > { %2521 = vmatprep.mubr.bf16.mxu1 %v3410_v62 }
 0x165   : > { %2522 = vmatmul.mubr.bf16.gmra.mrb[80].mxu1 %v1116_v21 }
 0x166   : > { %2525 = vmatprep.mubr.bf16.mxu1 %v1117_v5 }
 0x16d   : > { %2526 = vmatmul.mubr.bf16.gmra.mrb[84].mxu1 %v1118_v8 }
 0x16e   : > { %2529 = vmatprep.mubr.bf16.mxu1 %v1119_v20 }
 0x175   : > { %2530 = vmatmul.mubr.bf16.gmra.mrb[88].mxu1 %v1120_v44 }
 0x176   : > { %2533 = vmatprep.mubr.bf16.mxu1 %v1121_v59 }
 0x17d   : > { %2534 = vmatmul.mubr.bf16.gmra.mrb[92].mxu1 %v1122_v48 }
 0x1d8   : > { %v2475_v22 = vpop.f32.mrb[32].mxu1 }
 0x1d9   : > { %v1237_v23 = vadd.f32 %v2475_v22, %v3194_v11  ;;  %v1228_v38 = vpop.f32.mrb[33].mxu1 }
 0x1da   : > { %v1229_v50 = vadd.f32 %v3194_v11, %v1228_v38  ;;  %v2476_v34 = vpop.f32.mrb[34].mxu1 }
 0x1db   : > { %v1549_v4 = vmul.f32 0.2, %v1237_v23  ;;  %v1240_v18 = vadd.f32 %v2476_v34, %v3194_v11  ;;  %v1231_v27 = vpop.f32.mrb[35].mxu1  ;;  %vm1485_vm0 = vcmp.gt.f32.partialorder %v1237_v23, 0.0 }
 0x1dc   : > { %v1547_v16 = vmul.f32 0.2, %v1229_v50  ;;  %v1232_v32 = vadd.f32 %v3194_v11, %v1231_v27  ;;  %vm1483_vm1 = vcmp.gt.f32.partialorder %v1229_v50, 0.0 }
 0x1dd   : > { %vm1486_vm2 = vcmp.gt.f32.partialorder %v1240_v18, 0.0  ;;  %v1550_v33 = vmul.f32 0.2, %v1240_v18  ;;  %v1613_v19 = vsel %vm1485_vm0, %v1237_v23, %v1549_v4 }
 0x1de   : > { %vm1484_vm3 = vcmp.gt.f32.partialorder %v1232_v32, 0.0  ;;  %v1548_v57 = vmul.f32 0.2, %v1232_v32  ;;  %v1611_v54 = vsel %vm1483_vm1, %v1229_v50, %v1547_v16 }
 0x1df   : > { %v1614_v24 = vsel %vm1486_vm2, %v1240_v18, %v1550_v33 }
 0x1e0   : > { %v1676_v30 = vpack.c.bf16 %v1614_v24, %v1613_v19  ;;  %v2479_v36 = vpop.f32.mrb[36].mxu1  ;;  %v1612_v3 = vsel %vm1484_vm3, %v1232_v32, %v1548_v57 }
 0x1e1   : > { %v1253_v15 = vadd.f32 %v2479_v36, %v3194_v11  ;;  %v1244_v12 = vpop.f32.mrb[37].mxu1  ;;  %v1675_v43 = vpack.c.bf16 %v1612_v3, %v1611_v54 }
 0x1e2   : > { %v1245_v45 = vadd.f32 %v3194_v11, %v1244_v12  ;;  %v2480_v61 = vpop.f32.mrb[38].mxu1 }
 0x1e3   : > { %v1553_v17 = vmul.f32 0.2, %v1253_v15  ;;  %v1256_v47 = vadd.f32 %v2480_v61, %v3194_v11  ;;  %v1247_v25 = vpop.f32.mrb[39].mxu1  ;;  %2553 = vmatprep.mubr.bf16.mxu0 %v1675_v43  ;;  %vm1489_vm4 = vcmp.gt.f32.partialorder %v1253_v15, 0.0 }
 0x1e4   : > { %v1551_v53 = vmul.f32 0.2, %v1245_v45  ;;  %v1248_v14 = vadd.f32 %v3194_v11, %v1247_v25  ;;  %2554 = vmatmul.mubr.bf16.vlgmr.msra.gmra.mrb[32].mxu0 %v1676_v30  ;;  %vm1487_vm5 = vcmp.gt.f32.partialorder %v1245_v45, 0.0 }
 0x1e5   : > { %vm1490_vm6 = vcmp.gt.f32.partialorder %v1256_v47, 0.0  ;;  %v1554_v37 = vmul.f32 0.2, %v1256_v47  ;;  %v1617_v46 = vsel %vm1489_vm4, %v1253_v15, %v1553_v17 }
 0x1e6   : > { %vm1488_vm7 = vcmp.gt.f32.partialorder %v1248_v14, 0.0  ;;  %v1552_v29 = vmul.f32 0.2, %v1248_v14  ;;  %v1615_v60 = vsel %vm1487_vm5, %v1245_v45, %v1551_v53 }
 0x1e7   : > { %v1618_v21 = vsel %vm1490_vm6, %v1256_v47, %v1554_v37 }
 0x1e8   : > { %v2483_v10 = vpop.f32.mrb[40].mxu1  ;;  %v1616_v41 = vsel %vm1488_vm7, %v1248_v14, %v1552_v29  ;;  %v1678_v55 = vpack.c.bf16 %v1618_v21, %v1617_v46 }
 0x1e9   : > { %v1269_v7 = vadd.f32 %v2483_v10, %v3194_v11  ;;  %v1260_v28 = vpop.f32.mrb[41].mxu1  ;;  %v1677_v5 = vpack.c.bf16 %v1616_v41, %v1615_v60 }
 0x1ea   : > { %v1261_v35 = vadd.f32 %v3194_v11, %v1260_v28  ;;  %v2484_v6 = vpop.f32.mrb[42].mxu1 }
 0x1eb   : > { %v1557_v40 = vmul.f32 0.2, %v1269_v7  ;;  %v1272_v52 = vadd.f32 %v2484_v6, %v3194_v11  ;;  %v1263_v63 = vpop.f32.mrb[43].mxu1  ;;  %2557 = vmatprep.mubr.bf16.mxu0 %v1677_v5  ;;  %vm1493_vm8 = vcmp.gt.f32.partialorder %v1269_v7, 0.0 }
 0x1ec   : > { %v1555_v8 = vmul.f32 0.2, %v1261_v35  ;;  %v1264_v26 = vadd.f32 %v3194_v11, %v1263_v63  ;;  %2558 = vmatmul.mubr.bf16.gmra.mrb[36].mxu0 %v1678_v55  ;;  %vm1491_vm9 = vcmp.gt.f32.partialorder %v1261_v35, 0.0 }
 0x1ed   : > { %vm1494_vm10 = vcmp.gt.f32.partialorder %v1272_v52, 0.0  ;;  %v1558_v58 = vmul.f32 0.2, %v1272_v52  ;;  %v1621_v0 = vsel %vm1493_vm8, %v1269_v7, %v1557_v40 }
 0x1ee   : > { %vm1492_vm11 = vcmp.gt.f32.partialorder %v1264_v26, 0.0  ;;  %v1556_v42 = vmul.f32 0.2, %v1264_v26  ;;  %v1619_v20 = vsel %vm1491_vm9, %v1261_v35, %v1555_v8 }
 0x1ef   : > { %v1622_v31 = vsel %vm1494_vm10, %v1272_v52, %v1558_v58 }
 0x1f0   : > { %v2487_v49 = vpop.f32.mrb[44].mxu1  ;;  %v1620_v51 = vsel %vm1492_vm11, %v1264_v26, %v1556_v42  ;;  %v1680_v39 = vpack.c.bf16 %v1622_v31, %v1621_v0 }
 0x1f1   : > { %v1285_v44 = vadd.f32 %v2487_v49, %v3194_v11  ;;  %v1276_v56 = vpop.f32.mrb[45].mxu1  ;;  %v1679_v9 = vpack.c.bf16 %v1620_v51, %v1619_v20 }
 0x1f2   : > { %v1277_v1 = vadd.f32 %v3194_v11, %v1276_v56  ;;  %v2488_v13 = vpop.f32.mrb[46].mxu1 }
 0x1f3   : > { %v1561_v48 = vmul.f32 0.2, %v1285_v44  ;;  %v1288_v59 = vadd.f32 %v2488_v13, %v3194_v11  ;;  %v1279_v62 = vpop.f32.mrb[47].mxu1  ;;  %2561 = vmatprep.mubr.bf16.mxu0 %v1679_v9  ;;  %vm1497_vm12 = vcmp.gt.f32.partialorder %v1285_v44, 0.0 }
 0x1f4   : > { %v1559_v2 = vmul.f32 0.2, %v1277_v1  ;;  %v1280_v22 = vadd.f32 %v3194_v11, %v1279_v62  ;;  %2562 = vmatmul.mubr.bf16.gmra.mrb[40].mxu0 %v1680_v39  ;;  %vm1495_vm13 = vcmp.gt.f32.partialorder %v1277_v1, 0.0 }
 0x1f5   : > { %vm1498_vm14 = vcmp.gt.f32.partialorder %v1288_v59, 0.0  ;;  %v1562_v23 = vmul.f32 0.2, %v1288_v59  ;;  %v1625_v50 = vsel %vm1497_vm12, %v1285_v44, %v1561_v48 }
 0x1f6   : > { %vm1496_vm15 = vcmp.gt.f32.partialorder %v1280_v22, 0.0  ;;  %v1560_v38 = vmul.f32 0.2, %v1280_v22  ;;  %v1623_v18 = vsel %vm1495_vm13, %v1277_v1, %v1559_v2 }
 0x1f7   : > { %v1626_v34 = vsel %vm1498_vm14, %v1288_v59, %v1562_v23 }
 0x1f8   : > { %v2491_v4 = vpop.f32.mrb[48].mxu1  ;;  %v1624_v27 = vsel %vm1496_vm15, %v1280_v22, %v1560_v38  ;;  %v1682_v16 = vpack.c.bf16 %v1626_v34, %v1625_v50 }
 0x1f9   : > { %v1301_v32 = vadd.f32 %v2491_v4, %v3194_v11  ;;  %v1292_v33 = vpop.f32.mrb[49].mxu1  ;;  %v1681_v57 = vpack.c.bf16 %v1624_v27, %v1623_v18 }
 0x1fa   : > { %v1293_v19 = vadd.f32 %v3194_v11, %v1292_v33  ;;  %v2492_v24 = vpop.f32.mrb[50].mxu1 }
 0x1fb   : > { %v1565_v30 = vmul.f32 0.2, %v1301_v32  ;;  %v1304_v36 = vadd.f32 %v2492_v24, %v3194_v11  ;;  %v1295_v54 = vpop.f32.mrb[51].mxu1  ;;  %2565 = vmatprep.mubr.bf16.mxu0 %v1681_v57  ;;  %vm1501_vm0 = vcmp.gt.f32.partialorder %v1301_v32, 0.0 }
 0x1fc   : > { %v1563_v3 = vmul.f32 0.2, %v1293_v19  ;;  %v1296_v15 = vadd.f32 %v3194_v11, %v1295_v54  ;;  %2566 = vmatmul.mubr.bf16.gmra.mrb[44].mxu0 %v1682_v16  ;;  %vm1499_vm1 = vcmp.gt.f32.partialorder %v1293_v19, 0.0 }
 0x1fd   : > { %vm1502_vm2 = vcmp.gt.f32.partialorder %v1304_v36, 0.0  ;;  %v1566_v12 = vmul.f32 0.2, %v1304_v36  ;;  %v1629_v45 = vsel %vm1501_vm0, %v1301_v32, %v1565_v30 }
 0x1fe   : > { %vm1500_vm3 = vcmp.gt.f32.partialorder %v1296_v15, 0.0  ;;  %v1564_v43 = vmul.f32 0.2, %v1296_v15  ;;  %v1627_v47 = vsel %vm1499_vm1, %v1293_v19, %v1563_v3 }
 0x1ff   : > { %v1630_v61 = vsel %vm1502_vm2, %v1304_v36, %v1566_v12 }
 0x200   : > { %v2495_v17 = vpop.f32.mrb[52].mxu1  ;;  %v1628_v25 = vsel %vm1500_vm3, %v1296_v15, %v1564_v43  ;;  %v1684_v53 = vpack.c.bf16 %v1630_v61, %v1629_v45 }
 0x201   : > { %v1317_v14 = vadd.f32 %v2495_v17, %v3194_v11  ;;  %v1308_v37 = vpop.f32.mrb[53].mxu1  ;;  %v1683_v29 = vpack.c.bf16 %v1628_v25, %v1627_v47 }
 0x202   : > { %v1309_v46 = vadd.f32 %v3194_v11, %v1308_v37  ;;  %v2496_v21 = vpop.f32.mrb[54].mxu1 }
 0x203   : > { %v1569_v10 = vmul.f32 0.2, %v1317_v14  ;;  %v1320_v60 = vadd.f32 %v2496_v21, %v3194_v11  ;;  %v1311_v41 = vpop.f32.mrb[55].mxu1  ;;  %2569 = vmatprep.mubr.bf16.mxu0 %v1683_v29  ;;  %vm1505_vm4 = vcmp.gt.f32.partialorder %v1317_v14, 0.0 }
 0x204   : > { %v1567_v55 = vmul.f32 0.2, %v1309_v46  ;;  %v1312_v7 = vadd.f32 %v3194_v11, %v1311_v41  ;;  %2570 = vmatmul.mubr.bf16.gmra.mrb[48].mxu0 %v1684_v53  ;;  %vm1503_vm5 = vcmp.gt.f32.partialorder %v1309_v46, 0.0 }
 0x205   : > { %vm1506_vm6 = vcmp.gt.f32.partialorder %v1320_v60, 0.0  ;;  %v1570_v28 = vmul.f32 0.2, %v1320_v60  ;;  %v1633_v35 = vsel %vm1505_vm4, %v1317_v14, %v1569_v10 }
 0x206   : > { %vm1504_vm7 = vcmp.gt.f32.partialorder %v1312_v7, 0.0  ;;  %v1568_v5 = vmul.f32 0.2, %v1312_v7  ;;  %v1631_v52 = vsel %vm1503_vm5, %v1309_v46, %v1567_v55 }
 0x207   : > { %v1634_v6 = vsel %vm1506_vm6, %v1320_v60, %v1570_v28 }
 0x208   : > { %v2499_v40 = vpop.f32.mrb[56].mxu1  ;;  %v1632_v63 = vsel %vm1504_vm7, %v1312_v7, %v1568_v5  ;;  %v1686_v8 = vpack.c.bf16 %v1634_v6, %v1633_v35 }
 0x209   : > { %v1333_v26 = vadd.f32 %v2499_v40, %v3194_v11  ;;  %v1324_v58 = vpop.f32.mrb[57].mxu1  ;;  %v1685_v42 = vpack.c.bf16 %v1632_v63, %v1631_v52 }
 0x20a   : > { %v1325_v0 = vadd.f32 %v3194_v11, %v1324_v58  ;;  %v2500_v31 = vpop.f32.mrb[58].mxu1 }
 0x20b   : > { %v1573_v49 = vmul.f32 0.2, %v1333_v26  ;;  %v1336_v20 = vadd.f32 %v2500_v31, %v3194_v11  ;;  %v1327_v51 = vpop.f32.mrb[59].mxu1  ;;  %2573 = vmatprep.mubr.bf16.mxu0 %v1685_v42  ;;  %vm1509_vm8 = vcmp.gt.f32.partialorder %v1333_v26, 0.0 }
 0x20c   : > { %v1571_v39 = vmul.f32 0.2, %v1325_v0  ;;  %v1328_v44 = vadd.f32 %v3194_v11, %v1327_v51  ;;  %2574 = vmatmul.mubr.bf16.gmra.mrb[52].mxu0 %v1686_v8  ;;  %vm1507_vm9 = vcmp.gt.f32.partialorder %v1325_v0, 0.0 }
 0x20d   : > { %vm1510_vm10 = vcmp.gt.f32.partialorder %v1336_v20, 0.0  ;;  %v1574_v56 = vmul.f32 0.2, %v1336_v20  ;;  %v1637_v1 = vsel %vm1509_vm8, %v1333_v26, %v1573_v49 }
 0x20e   : > { %vm1508_vm11 = vcmp.gt.f32.partialorder %v1328_v44, 0.0  ;;  %v1572_v9 = vmul.f32 0.2, %v1328_v44  ;;  %v1635_v59 = vsel %vm1507_vm9, %v1325_v0, %v1571_v39 }
 0x20f   : > { %v1638_v13 = vsel %vm1510_vm10, %v1336_v20, %v1574_v56 }
 0x210   : > { %v2503_v48 = vpop.f32.mrb[60].mxu1  ;;  %v1636_v62 = vsel %vm1508_vm11, %v1328_v44, %v1572_v9  ;;  %v1688_v2 = vpack.c.bf16 %v1638_v13, %v1637_v1 }
 0x211   : > { %v1349_v22 = vadd.f32 %v2503_v48, %v3194_v11  ;;  %v1340_v23 = vpop.f32.mrb[61].mxu1  ;;  %v1687_v38 = vpack.c.bf16 %v1636_v62, %v1635_v59 }
 0x212   : > { %v1341_v50 = vadd.f32 %v3194_v11, %v1340_v23  ;;  %v2504_v34 = vpop.f32.mrb[62].mxu1 }
 0x213   : > { %v1577_v4 = vmul.f32 0.2, %v1349_v22  ;;  %v1352_v18 = vadd.f32 %v2504_v34, %v3194_v11  ;;  %v1343_v27 = vpop.f32.mrb[63].mxu1  ;;  %2577 = vmatprep.mubr.bf16.mxu0 %v1687_v38  ;;  %vm1513_vm12 = vcmp.gt.f32.partialorder %v1349_v22, 0.0 }
 0x214   : > { %v1575_v16 = vmul.f32 0.2, %v1341_v50  ;;  %v1344_v32 = vadd.f32 %v3194_v11, %v1343_v27  ;;  %2578 = vmatmul.mubr.bf16.gmra.mrb[56].mxu0 %v1688_v2  ;;  %vm1511_vm13 = vcmp.gt.f32.partialorder %v1341_v50, 0.0 }
 0x215   : > { %vm1514_vm14 = vcmp.gt.f32.partialorder %v1352_v18, 0.0  ;;  %v1578_v33 = vmul.f32 0.2, %v1352_v18  ;;  %v1641_v19 = vsel %vm1513_vm12, %v1349_v22, %v1577_v4 }
 0x216   : > { %vm1512_vm15 = vcmp.gt.f32.partialorder %v1344_v32, 0.0  ;;  %v1576_v57 = vmul.f32 0.2, %v1344_v32  ;;  %v1639_v36 = vsel %vm1511_vm13, %v1341_v50, %v1575_v16 }
 0x217   : > { %v1642_v24 = vsel %vm1514_vm14, %v1352_v18, %v1578_v33 }
 0x218   : > { %v2507_v30 = vpop.f32.mrb[64].mxu1  ;;  %v1640_v54 = vsel %vm1512_vm15, %v1344_v32, %v1576_v57  ;;  %v1690_v3 = vpack.c.bf16 %v1642_v24, %v1641_v19 }
 0x219   : > { %v1365_v15 = vadd.f32 %v2507_v30, %v3194_v11  ;;  %v1356_v12 = vpop.f32.mrb[65].mxu1  ;;  %v1689_v43 = vpack.c.bf16 %v1640_v54, %v1639_v36 }
 0x21a   : > { %v1357_v45 = vadd.f32 %v3194_v11, %v1356_v12  ;;  %v2508_v61 = vpop.f32.mrb[66].mxu1 }
 0x21b   : > { %v1581_v17 = vmul.f32 0.2, %v1365_v15  ;;  %v1368_v47 = vadd.f32 %v2508_v61, %v3194_v11  ;;  %v1359_v25 = vpop.f32.mrb[67].mxu1  ;;  %2581 = vmatprep.mubr.bf16.mxu0 %v1689_v43  ;;  %vm1517_vm0 = vcmp.gt.f32.partialorder %v1365_v15, 0.0 }
 0x21c   : > { %v1579_v53 = vmul.f32 0.2, %v1357_v45  ;;  %v1360_v14 = vadd.f32 %v3194_v11, %v1359_v25  ;;  %2582 = vmatmul.mubr.bf16.gmra.mrb[60].mxu0 %v1690_v3  ;;  %vm1515_vm1 = vcmp.gt.f32.partialorder %v1357_v45, 0.0 }
 0x21d   : > { %vm1518_vm2 = vcmp.gt.f32.partialorder %v1368_v47, 0.0  ;;  %v1582_v37 = vmul.f32 0.2, %v1368_v47  ;;  %v1645_v46 = vsel %vm1517_vm0, %v1365_v15, %v1581_v17 }
 0x21e   : > { %vm1516_vm3 = vcmp.gt.f32.partialorder %v1360_v14, 0.0  ;;  %v1580_v29 = vmul.f32 0.2, %v1360_v14  ;;  %v1643_v60 = vsel %vm1515_vm1, %v1357_v45, %v1579_v53 }
 0x21f   : > { %v1646_v21 = vsel %vm1518_vm2, %v1368_v47, %v1582_v37 }
 0x220   : > { %v2511_v10 = vpop.f32.mrb[68].mxu1  ;;  %v1644_v41 = vsel %vm1516_vm3, %v1360_v14, %v1580_v29  ;;  %v1692_v55 = vpack.c.bf16 %v1646_v21, %v1645_v46 }
 0x221   : > { %v1381_v7 = vadd.f32 %v2511_v10, %v3194_v11  ;;  %v1372_v28 = vpop.f32.mrb[69].mxu1  ;;  %v1691_v5 = vpack.c.bf16 %v1644_v41, %v1643_v60 }
 0x222   : > { %v1373_v35 = vadd.f32 %v3194_v11, %v1372_v28  ;;  %v2512_v6 = vpop.f32.mrb[70].mxu1 }
 0x223   : > { %v1585_v40 = vmul.f32 0.2, %v1381_v7  ;;  %v1384_v52 = vadd.f32 %v2512_v6, %v3194_v11  ;;  %v1375_v63 = vpop.f32.mrb[71].mxu1  ;;  %2585 = vmatprep.mubr.bf16.mxu0 %v1691_v5  ;;  %vm1521_vm4 = vcmp.gt.f32.partialorder %v1381_v7, 0.0 }
 0x224   : > { %v1583_v8 = vmul.f32 0.2, %v1373_v35  ;;  %v1376_v26 = vadd.f32 %v3194_v11, %v1375_v63  ;;  %2586 = vmatmul.mubr.bf16.gmra.mrb[64].mxu0 %v1692_v55  ;;  %vm1519_vm5 = vcmp.gt.f32.partialorder %v1373_v35, 0.0 }
 0x225   : > { %vm1522_vm6 = vcmp.gt.f32.partialorder %v1384_v52, 0.0  ;;  %v1586_v58 = vmul.f32 0.2, %v1384_v52  ;;  %v1649_v0 = vsel %vm1521_vm4, %v1381_v7, %v1585_v40 }
 0x226   : > { %vm1520_vm7 = vcmp.gt.f32.partialorder %v1376_v26, 0.0  ;;  %v1584_v42 = vmul.f32 0.2, %v1376_v26  ;;  %v1647_v20 = vsel %vm1519_vm5, %v1373_v35, %v1583_v8 }
 0x227   : > { %v1650_v31 = vsel %vm1522_vm6, %v1384_v52, %v1586_v58 }
 0x228   : > { %v2515_v49 = vpop.f32.mrb[72].mxu1  ;;  %v1648_v51 = vsel %vm1520_vm7, %v1376_v26, %v1584_v42  ;;  %v1694_v39 = vpack.c.bf16 %v1650_v31, %v1649_v0 }
 0x229   : > { %v1397_v44 = vadd.f32 %v2515_v49, %v3194_v11  ;;  %v1388_v56 = vpop.f32.mrb[73].mxu1  ;;  %v1693_v9 = vpack.c.bf16 %v1648_v51, %v1647_v20 }
 0x22a   : > { %v1389_v1 = vadd.f32 %v3194_v11, %v1388_v56  ;;  %v2516_v13 = vpop.f32.mrb[74].mxu1 }
 0x22b   : > { %v1589_v48 = vmul.f32 0.2, %v1397_v44  ;;  %v1400_v59 = vadd.f32 %v2516_v13, %v3194_v11  ;;  %v1391_v62 = vpop.f32.mrb[75].mxu1  ;;  %2589 = vmatprep.mubr.bf16.mxu0 %v1693_v9  ;;  %vm1525_vm8 = vcmp.gt.f32.partialorder %v1397_v44, 0.0 }
 0x22c   : > { %v1587_v2 = vmul.f32 0.2, %v1389_v1  ;;  %v1392_v22 = vadd.f32 %v3194_v11, %v1391_v62  ;;  %2590 = vmatmul.mubr.bf16.gmra.mrb[68].mxu0 %v1694_v39  ;;  %vm1523_vm9 = vcmp.gt.f32.partialorder %v1389_v1, 0.0 }
 0x22d   : > { %vm1526_vm10 = vcmp.gt.f32.partialorder %v1400_v59, 0.0  ;;  %v1590_v23 = vmul.f32 0.2, %v1400_v59  ;;  %v1653_v50 = vsel %vm1525_vm8, %v1397_v44, %v1589_v48 }
 0x22e   : > { %vm1524_vm11 = vcmp.gt.f32.partialorder %v1392_v22, 0.0  ;;  %v1588_v38 = vmul.f32 0.2, %v1392_v22  ;;  %v1651_v18 = vsel %vm1523_vm9, %v1389_v1, %v1587_v2 }
 0x22f   : > { %v1654_v34 = vsel %vm1526_vm10, %v1400_v59, %v1590_v23 }
 0x230   : > { %v2519_v4 = vpop.f32.mrb[76].mxu1  ;;  %v1652_v27 = vsel %vm1524_vm11, %v1392_v22, %v1588_v38  ;;  %v1696_v16 = vpack.c.bf16 %v1654_v34, %v1653_v50 }
 0x231   : > { %v1413_v32 = vadd.f32 %v2519_v4, %v3194_v11  ;;  %v1404_v33 = vpop.f32.mrb[77].mxu1  ;;  %v1695_v57 = vpack.c.bf16 %v1652_v27, %v1651_v18 }
 0x232   : > { %v1405_v19 = vadd.f32 %v3194_v11, %v1404_v33  ;;  %v2520_v24 = vpop.f32.mrb[78].mxu1 }
 0x233   : > { %v1593_v30 = vmul.f32 0.2, %v1413_v32  ;;  %v1416_v36 = vadd.f32 %v2520_v24, %v3194_v11  ;;  %v1407_v54 = vpop.f32.mrb[79].mxu1  ;;  %2593 = vmatprep.mubr.bf16.mxu0 %v1695_v57  ;;  %vm1529_vm12 = vcmp.gt.f32.partialorder %v1413_v32, 0.0 }
 0x234   : > { %v1591_v3 = vmul.f32 0.2, %v1405_v19  ;;  %v1408_v15 = vadd.f32 %v3194_v11, %v1407_v54  ;;  %2594 = vmatmul.mubr.bf16.gmra.mrb[72].mxu0 %v1696_v16  ;;  %vm1527_vm13 = vcmp.gt.f32.partialorder %v1405_v19, 0.0 }
 0x235   : > { %vm1530_vm14 = vcmp.gt.f32.partialorder %v1416_v36, 0.0  ;;  %v1594_v12 = vmul.f32 0.2, %v1416_v36  ;;  %v1657_v45 = vsel %vm1529_vm12, %v1413_v32, %v1593_v30 }
 0x236   : > { %vm1528_vm15 = vcmp.gt.f32.partialorder %v1408_v15, 0.0  ;;  %v1592_v43 = vmul.f32 0.2, %v1408_v15  ;;  %v1655_v47 = vsel %vm1527_vm13, %v1405_v19, %v1591_v3 }
 0x237   : > { %v1658_v61 = vsel %vm1530_vm14, %v1416_v36, %v1594_v12 }
 0x238   : > { %v2523_v17 = vpop.f32.mrb[80].mxu1  ;;  %v1656_v25 = vsel %vm1528_vm15, %v1408_v15, %v1592_v43  ;;  %v1698_v53 = vpack.c.bf16 %v1658_v61, %v1657_v45 }
 0x239   : > { %v1429_v14 = vadd.f32 %v2523_v17, %v3194_v11  ;;  %v1420_v37 = vpop.f32.mrb[81].mxu1  ;;  %v1697_v29 = vpack.c.bf16 %v1656_v25, %v1655_v47 }
 0x23a   : > { %v1421_v46 = vadd.f32 %v3194_v11, %v1420_v37  ;;  %v2524_v21 = vpop.f32.mrb[82].mxu1 }
 0x23b   : > { %v1597_v10 = vmul.f32 0.2, %v1429_v14  ;;  %v1432_v60 = vadd.f32 %v2524_v21, %v3194_v11  ;;  %v1423_v41 = vpop.f32.mrb[83].mxu1  ;;  %2597 = vmatprep.mubr.bf16.mxu0 %v1697_v29  ;;  %vm1533_vm0 = vcmp.gt.f32.partialorder %v1429_v14, 0.0 }
 0x23c   : > { %v1595_v55 = vmul.f32 0.2, %v1421_v46  ;;  %v1424_v7 = vadd.f32 %v3194_v11, %v1423_v41  ;;  %2598 = vmatmul.mubr.bf16.gmra.mrb[76].mxu0 %v1698_v53  ;;  %vm1531_vm1 = vcmp.gt.f32.partialorder %v1421_v46, 0.0 }
 0x23d   : > { %vm1534_vm2 = vcmp.gt.f32.partialorder %v1432_v60, 0.0  ;;  %v1598_v28 = vmul.f32 0.2, %v1432_v60  ;;  %v1661_v35 = vsel %vm1533_vm0, %v1429_v14, %v1597_v10 }
 0x23e   : > { %vm1532_vm3 = vcmp.gt.f32.partialorder %v1424_v7, 0.0  ;;  %v1596_v5 = vmul.f32 0.2, %v1424_v7  ;;  %v1659_v52 = vsel %vm1531_vm1, %v1421_v46, %v1595_v55 }
 0x23f   : > { %v1662_v6 = vsel %vm1534_vm2, %v1432_v60, %v1598_v28 }
 0x240   : > { %v2527_v40 = vpop.f32.mrb[84].mxu1  ;;  %v1660_v63 = vsel %vm1532_vm3, %v1424_v7, %v1596_v5  ;;  %v1700_v8 = vpack.c.bf16 %v1662_v6, %v1661_v35  ;;  %v3264_v7 = vld [vmem:[%s3408_s6] ss:$0 sm:$0xff] }
 0x241   : > { %v1445_v26 = vadd.f32 %v2527_v40, %v3194_v11  ;;  %v1436_v58 = vpop.f32.mrb[85].mxu1  ;;  %v1699_v42 = vpack.c.bf16 %v1660_v63, %v1659_v52 }
 0x242   : > { %v1437_v0 = vadd.f32 %v3194_v11, %v1436_v58  ;;  %v2528_v31 = vpop.f32.mrb[86].mxu1 }
 0x243   : > { %v1601_v49 = vmul.f32 0.2, %v1445_v26  ;;  %v1448_v20 = vadd.f32 %v2528_v31, %v3194_v11  ;;  %v1439_v51 = vpop.f32.mrb[87].mxu1  ;;  %2601 = vmatprep.mubr.bf16.mxu0 %v1699_v42  ;;  %vm1537_vm4 = vcmp.gt.f32.partialorder %v1445_v26, 0.0 }
 0x244   : > { %v1599_v39 = vmul.f32 0.2, %v1437_v0  ;;  %v1440_v44 = vadd.f32 %v3194_v11, %v1439_v51  ;;  %2602 = vmatmul.mubr.bf16.gmra.mrb[80].mxu0 %v1700_v8  ;;  %vm1535_vm5 = vcmp.gt.f32.partialorder %v1437_v0, 0.0 }
 0x245   : > { %vm1538_vm6 = vcmp.gt.f32.partialorder %v1448_v20, 0.0  ;;  %v1602_v56 = vmul.f32 0.2, %v1448_v20  ;;  %v1665_v1 = vsel %vm1537_vm4, %v1445_v26, %v1601_v49 }
 0x246   : > { %vm1536_vm7 = vcmp.gt.f32.partialorder %v1440_v44, 0.0  ;;  %v1600_v9 = vmul.f32 0.2, %v1440_v44  ;;  %v1663_v59 = vsel %vm1535_vm5, %v1437_v0, %v1599_v39 }
 0x247   : > { %v1666_v13 = vsel %vm1538_vm6, %v1448_v20, %v1602_v56 }
 0x248   : > { %v2531_v48 = vpop.f32.mrb[88].mxu1  ;;  %v1664_v62 = vsel %vm1536_vm7, %v1440_v44, %v1600_v9  ;;  %v1702_v2 = vpack.c.bf16 %v1666_v13, %v1665_v1 }
 0x249   : > { %v1461_v22 = vadd.f32 %v2531_v48, %v3194_v11  ;;  %v1452_v23 = vpop.f32.mrb[89].mxu1  ;;  %v1701_v38 = vpack.c.bf16 %v1664_v62, %v1663_v59 }
 0x24a   : > { %v1453_v50 = vadd.f32 %v3194_v11, %v1452_v23  ;;  %v2532_v34 = vpop.f32.mrb[90].mxu1 }
 0x24b   : > { %v1605_v4 = vmul.f32 0.2, %v1461_v22  ;;  %v1464_v18 = vadd.f32 %v2532_v34, %v3194_v11  ;;  %v1455_v27 = vpop.f32.mrb[91].mxu1  ;;  %2605 = vmatprep.mubr.bf16.mxu0 %v1701_v38  ;;  %vm1541_vm8 = vcmp.gt.f32.partialorder %v1461_v22, 0.0 }
 0x24c   : > { %v1603_v16 = vmul.f32 0.2, %v1453_v50  ;;  %v1456_v32 = vadd.f32 %v3194_v11, %v1455_v27  ;;  %2606 = vmatmul.mubr.bf16.gmra.mrb[84].mxu0 %v1702_v2  ;;  %vm1539_vm9 = vcmp.gt.f32.partialorder %v1453_v50, 0.0 }
 0x24d   : > { %vm1542_vm10 = vcmp.gt.f32.partialorder %v1464_v18, 0.0  ;;  %v1606_v33 = vmul.f32 0.2, %v1464_v18  ;;  %v1669_v19 = vsel %vm1541_vm8, %v1461_v22, %v1605_v4 }
 0x24e   : > { %vm1540_vm11 = vcmp.gt.f32.partialorder %v1456_v32, 0.0  ;;  %v1604_v57 = vmul.f32 0.2, %v1456_v32  ;;  %v1667_v36 = vsel %vm1539_vm9, %v1453_v50, %v1603_v16 }
 0x24f   : > { %v1670_v24 = vsel %vm1542_vm10, %v1464_v18, %v1606_v33 }
 0x250   : > { %v2535_v30 = vpop.f32.mrb[92].mxu1  ;;  %v1668_v54 = vsel %vm1540_vm11, %v1456_v32, %v1604_v57  ;;  %v1704_v3 = vpack.c.bf16 %v1670_v24, %v1669_v19 }
 0x251   : > { %v1477_v15 = vadd.f32 %v2535_v30, %v3194_v11  ;;  %v1468_v12 = vpop.f32.mrb[93].mxu1  ;;  %v1703_v43 = vpack.c.bf16 %v1668_v54, %v1667_v36 }
 0x252   : > { %v1469_v45 = vadd.f32 %v3194_v11, %v1468_v12  ;;  %v2536_v61 = vpop.f32.mrb[94].mxu1 }
 0x253   : > { %v1609_v17 = vmul.f32 0.2, %v1477_v15  ;;  %v1480_v47 = vadd.f32 %v2536_v61, %v3194_v11  ;;  %v1471_v25 = vpop.f32.mrb[95].mxu1  ;;  %2609 = vmatprep.mubr.bf16.mxu0 %v1703_v43  ;;  %vm1545_vm12 = vcmp.gt.f32.partialorder %v1477_v15, 0.0 }
 0x254   : > { %v1607_v53 = vmul.f32 0.2, %v1469_v45  ;;  %v1472_v14 = vadd.f32 %v3194_v11, %v1471_v25  ;;  %2610 = vmatmul.mubr.bf16.gmra.mrb[88].mxu0 %v1704_v3  ;;  %vm1543_vm13 = vcmp.gt.f32.partialorder %v1469_v45, 0.0 }
 0x255   : > { %vm1546_vm14 = vcmp.gt.f32.partialorder %v1480_v47, 0.0  ;;  %v1610_v37 = vmul.f32 0.2, %v1480_v47  ;;  %v1673_v46 = vsel %vm1545_vm12, %v1477_v15, %v1609_v17 }
 0x256   : > { %vm1544_vm15 = vcmp.gt.f32.partialorder %v1472_v14, 0.0  ;;  %v1608_v29 = vmul.f32 0.2, %v1472_v14  ;;  %v1671_v10 = vsel %vm1543_vm13, %v1469_v45, %v1607_v53 }
 0x257   : > { %v1674_v21 = vsel %vm1546_vm14, %v1480_v47, %v1610_v37 }
 0x258   : > { %v1672_v60 = vsel %vm1544_vm15, %v1472_v14, %v1608_v29  ;;  %v1706_v41 = vpack.c.bf16 %v1674_v21, %v1673_v46 }
 0x259   : > { %v1705_v55 = vpack.c.bf16 %v1672_v60, %v1671_v10 }
 0x25b   : > { %2613 = vmatprep.mubr.bf16.mxu0 %v1705_v55 }
 0x25c   : > { %2614 = vmatmul.mubr.bf16.gmra.mrb[92].mxu0 %v1706_v41 }
 0x2b7   : > { %v2555_v11 = vpop.f32.mrb[32].mxu0 }
 0x2b8   : > { %v1821_v28 = vadd.f32 %v2555_v11, %v3264_v7  ;;  %v1812_v5 = vpop.f32.mrb[33].mxu0 }
 0x2b9   : > { %v1813_v35 = vadd.f32 %v3264_v7, %v1812_v5  ;;  %v2556_v6 = vpop.f32.mrb[34].mxu0 }
 0x2ba   : > { %2069 = vst [vmem:[%s3269_s23 + $0x10] sm:$0xff] %v1821_v28  ;;  %v1824_v40 = vadd.f32 %v2556_v6, %v3264_v7  ;;  %v1815_v52 = vpop.f32.mrb[35].mxu0 }
 0x2bb   : > { %2067 = vst [vmem:[%s3269_s23] sm:$0xff] %v1813_v35  ;;  %v1816_v63 = vadd.f32 %v3264_v7, %v1815_v52 }
 0x2bc   : > { %2070 = vst [vmem:[%s3269_s23 + $0x18] sm:$0xff] %v1824_v40 }
 0x2bd   : > { %2068 = vst [vmem:[%s3269_s23 + $0x8] sm:$0xff] %v1816_v63 }
 0x2bf   : > { %v2559_v8 = vpop.f32.mrb[36].mxu0 }
 0x2c0   : > { %v1837_v26 = vadd.f32 %v2559_v8, %v3264_v7  ;;  %v1828_v58 = vpop.f32.mrb[37].mxu0 }
 0x2c1   : > { %v1829_v42 = vadd.f32 %v3264_v7, %v1828_v58  ;;  %v2560_v0 = vpop.f32.mrb[38].mxu0 }
 0x2c2   : > { %2073 = vst [vmem:[%s3269_s23 + $0x30] sm:$0xff] %v1837_v26  ;;  %v1840_v31 = vadd.f32 %v2560_v0, %v3264_v7  ;;  %v1831_v49 = vpop.f32.mrb[39].mxu0 }
 0x2c3   : > { %2071 = vst [vmem:[%s3269_s23 + $0x20] sm:$0xff] %v1829_v42  ;;  %v1832_v20 = vadd.f32 %v3264_v7, %v1831_v49 }
 0x2c4   : > { %2074 = vst [vmem:[%s3269_s23 + $0x38] sm:$0xff] %v1840_v31 }
 0x2c5   : > { %2072 = vst [vmem:[%s3269_s23 + $0x28] sm:$0xff] %v1832_v20 }
 0x2c7   : > { %v2563_v51 = vpop.f32.mrb[40].mxu0 }
 0x2c8   : > { %v1853_v39 = vadd.f32 %v2563_v51, %v3264_v7  ;;  %v1844_v44 = vpop.f32.mrb[41].mxu0 }
 0x2c9   : > { %v1845_v56 = vadd.f32 %v3264_v7, %v1844_v44  ;;  %v2564_v9 = vpop.f32.mrb[42].mxu0 }
 0x2ca   : > { %2077 = vst [vmem:[%s3269_s23 + $0x50] sm:$0xff] %v1853_v39  ;;  %v1856_v1 = vadd.f32 %v2564_v9, %v3264_v7  ;;  %v1847_v13 = vpop.f32.mrb[43].mxu0 }
 0x2cb   : > { %2075 = vst [vmem:[%s3269_s23 + $0x40] sm:$0xff] %v1845_v56  ;;  %v1848_v48 = vadd.f32 %v3264_v7, %v1847_v13 }
 0x2cc   : > { %2078 = vst [vmem:[%s3269_s23 + $0x58] sm:$0xff] %v1856_v1 }
 0x2cd   : > { %2076 = vst [vmem:[%s3269_s23 + $0x48] sm:$0xff] %v1848_v48 }
 0x2cf   : > { %v2567_v59 = vpop.f32.mrb[44].mxu0 }
 0x2d0   : > { %v1869_v62 = vadd.f32 %v2567_v59, %v3264_v7  ;;  %v1860_v2 = vpop.f32.mrb[45].mxu0 }
 0x2d1   : > { %v1861_v22 = vadd.f32 %v3264_v7, %v1860_v2  ;;  %v2568_v23 = vpop.f32.mrb[46].mxu0 }
 0x2d2   : > { %2081 = vst [vmem:[%s3269_s23 + $0x70] sm:$0xff] %v1869_v62  ;;  %v1872_v38 = vadd.f32 %v2568_v23, %v3264_v7  ;;  %v1863_v50 = vpop.f32.mrb[47].mxu0 }
 0x2d3   : > { %2079 = vst [vmem:[%s3269_s23 + $0x60] sm:$0xff] %v1861_v22  ;;  %v1864_v34 = vadd.f32 %v3264_v7, %v1863_v50 }
 0x2d4   : > { %2082 = vst [vmem:[%s3269_s23 + $0x78] sm:$0xff] %v1872_v38 }
 0x2d5   : > { %2080 = vst [vmem:[%s3269_s23 + $0x68] sm:$0xff] %v1864_v34 }
 0x2d7   : > { %v2571_v4 = vpop.f32.mrb[48].mxu0 }
 0x2d8   : > { %v1885_v18 = vadd.f32 %v2571_v4, %v3264_v7  ;;  %v1876_v27 = vpop.f32.mrb[49].mxu0 }
 0x2d9   : > { %v1877_v16 = vadd.f32 %v3264_v7, %v1876_v27  ;;  %v2572_v32 = vpop.f32.mrb[50].mxu0 }
 0x2da   : > { %2085 = vst [vmem:[%s3269_s23 + $0x90] sm:$0xff] %v1885_v18  ;;  %v1888_v33 = vadd.f32 %v2572_v32, %v3264_v7  ;;  %v1879_v57 = vpop.f32.mrb[51].mxu0 }
 0x2db   : > { %2083 = vst [vmem:[%s3269_s23 + $0x80] sm:$0xff] %v1877_v16  ;;  %v1880_v19 = vadd.f32 %v3264_v7, %v1879_v57 }
 0x2dc   : > { %2086 = vst [vmem:[%s3269_s23 + $0x98] sm:$0xff] %v1888_v33 }
 0x2dd   : > { %2084 = vst [vmem:[%s3269_s23 + $0x88] sm:$0xff] %v1880_v19 }
 0x2df   : > { %v2575_v24 = vpop.f32.mrb[52].mxu0 }
 0x2e0   : > { %v1901_v30 = vadd.f32 %v2575_v24, %v3264_v7  ;;  %v1892_v36 = vpop.f32.mrb[53].mxu0 }
 0x2e1   : > { %v1893_v54 = vadd.f32 %v3264_v7, %v1892_v36  ;;  %v2576_v3 = vpop.f32.mrb[54].mxu0 }
 0x2e2   : > { %2089 = vst [vmem:[%s3269_s23 + $0xb0] sm:$0xff] %v1901_v30  ;;  %v1904_v15 = vadd.f32 %v2576_v3, %v3264_v7  ;;  %v1895_v12 = vpop.f32.mrb[55].mxu0 }
 0x2e3   : > { %2087 = vst [vmem:[%s3269_s23 + $0xa0] sm:$0xff] %v1893_v54  ;;  %v1896_v43 = vadd.f32 %v3264_v7, %v1895_v12 }
 0x2e4   : > { %2090 = vst [vmem:[%s3269_s23 + $0xb8] sm:$0xff] %v1904_v15 }
 0x2e5   : > { %2088 = vst [vmem:[%s3269_s23 + $0xa8] sm:$0xff] %v1896_v43 }
 0x2e7   : > { %v2579_v45 = vpop.f32.mrb[56].mxu0 }
 0x2e8   : > { %v1917_v61 = vadd.f32 %v2579_v45, %v3264_v7  ;;  %v1908_v17 = vpop.f32.mrb[57].mxu0 }
 0x2e9   : > { %v1909_v47 = vadd.f32 %v3264_v7, %v1908_v17  ;;  %v2580_v25 = vpop.f32.mrb[58].mxu0 }
 0x2ea   : > { %2093 = vst [vmem:[%s3269_s23 + $0xd0] sm:$0xff] %v1917_v61  ;;  %v1920_v53 = vadd.f32 %v2580_v25, %v3264_v7  ;;  %v1911_v14 = vpop.f32.mrb[59].mxu0 }
 0x2eb   : > { %2091 = vst [vmem:[%s3269_s23 + $0xc0] sm:$0xff] %v1909_v47  ;;  %v1912_v37 = vadd.f32 %v3264_v7, %v1911_v14 }
 0x2ec   : > { %2094 = vst [vmem:[%s3269_s23 + $0xd8] sm:$0xff] %v1920_v53 }
 0x2ed   : > { %2092 = vst [vmem:[%s3269_s23 + $0xc8] sm:$0xff] %v1912_v37 }
 0x2ef   : > { %v2583_v29 = vpop.f32.mrb[60].mxu0 }
 0x2f0   : > { %v1933_v46 = vadd.f32 %v2583_v29, %v3264_v7  ;;  %v1924_v21 = vpop.f32.mrb[61].mxu0 }
 0x2f1   : > { %v1925_v10 = vadd.f32 %v3264_v7, %v1924_v21  ;;  %v2584_v60 = vpop.f32.mrb[62].mxu0 }
 0x2f2   : > { %2097 = vst [vmem:[%s3269_s23 + $0xf0] sm:$0xff] %v1933_v46  ;;  %v1936_v41 = vadd.f32 %v2584_v60, %v3264_v7  ;;  %v1927_v55 = vpop.f32.mrb[63].mxu0 }
 0x2f3   : > { %2095 = vst [vmem:[%s3269_s23 + $0xe0] sm:$0xff] %v1925_v10  ;;  %v1928_v11 = vadd.f32 %v3264_v7, %v1927_v55 }
 0x2f4   : > { %2098 = vst [vmem:[%s3269_s23 + $0xf8] sm:$0xff] %v1936_v41 }
 0x2f5   : > { %2096 = vst [vmem:[%s3269_s23 + $0xe8] sm:$0xff] %v1928_v11 }
 0x2f7   : > { %v2587_v28 = vpop.f32.mrb[64].mxu0 }
 0x2f8   : > { %v1949_v5 = vadd.f32 %v2587_v28, %v3264_v7  ;;  %v1940_v35 = vpop.f32.mrb[65].mxu0 }
 0x2f9   : > { %v1941_v6 = vadd.f32 %v3264_v7, %v1940_v35  ;;  %v2588_v40 = vpop.f32.mrb[66].mxu0 }
 0x2fa   : > { %2101 = vst [vmem:[%s3269_s23 + $0x110] sm:$0xff] %v1949_v5  ;;  %v1952_v52 = vadd.f32 %v2588_v40, %v3264_v7  ;;  %v1943_v63 = vpop.f32.mrb[67].mxu0 }
 0x2fb   : > { %2099 = vst [vmem:[%s3269_s23 + $0x100] sm:$0xff] %v1941_v6  ;;  %v1944_v8 = vadd.f32 %v3264_v7, %v1943_v63 }
 0x2fc   : > { %2102 = vst [vmem:[%s3269_s23 + $0x118] sm:$0xff] %v1952_v52 }
 0x2fd   : > { %2100 = vst [vmem:[%s3269_s23 + $0x108] sm:$0xff] %v1944_v8 }
 0x2ff   : > { %v2591_v26 = vpop.f32.mrb[68].mxu0 }
 0x300   : > { %v1965_v58 = vadd.f32 %v2591_v26, %v3264_v7  ;;  %v1956_v42 = vpop.f32.mrb[69].mxu0 }
 0x301   : > { %v1957_v0 = vadd.f32 %v3264_v7, %v1956_v42  ;;  %v2592_v31 = vpop.f32.mrb[70].mxu0 }
 0x302   : > { %2105 = vst [vmem:[%s3269_s23 + $0x130] sm:$0xff] %v1965_v58  ;;  %v1968_v49 = vadd.f32 %v2592_v31, %v3264_v7  ;;  %v1959_v20 = vpop.f32.mrb[71].mxu0 }
 0x303   : > { %2103 = vst [vmem:[%s3269_s23 + $0x120] sm:$0xff] %v1957_v0  ;;  %v1960_v51 = vadd.f32 %v3264_v7, %v1959_v20 }
 0x304   : > { %2106 = vst [vmem:[%s3269_s23 + $0x138] sm:$0xff] %v1968_v49 }
 0x305   : > { %2104 = vst [vmem:[%s3269_s23 + $0x128] sm:$0xff] %v1960_v51 }
 0x307   : > { %v2595_v39 = vpop.f32.mrb[72].mxu0 }
 0x308   : > { %v1981_v44 = vadd.f32 %v2595_v39, %v3264_v7  ;;  %v1972_v56 = vpop.f32.mrb[73].mxu0 }
 0x309   : > { %v1973_v9 = vadd.f32 %v3264_v7, %v1972_v56  ;;  %v2596_v1 = vpop.f32.mrb[74].mxu0 }
 0x30a   : > { %2109 = vst [vmem:[%s3269_s23 + $0x150] sm:$0xff] %v1981_v44  ;;  %v1984_v13 = vadd.f32 %v2596_v1, %v3264_v7  ;;  %v1975_v48 = vpop.f32.mrb[75].mxu0 }
 0x30b   : > { %2107 = vst [vmem:[%s3269_s23 + $0x140] sm:$0xff] %v1973_v9  ;;  %v1976_v59 = vadd.f32 %v3264_v7, %v1975_v48 }
 0x30c   : > { %2110 = vst [vmem:[%s3269_s23 + $0x158] sm:$0xff] %v1984_v13 }
 0x30d   : > { %2108 = vst [vmem:[%s3269_s23 + $0x148] sm:$0xff] %v1976_v59 }
 0x30f   : > { %v2599_v62 = vpop.f32.mrb[76].mxu0 }
 0x310   : > { %v1997_v2 = vadd.f32 %v2599_v62, %v3264_v7  ;;  %v1988_v22 = vpop.f32.mrb[77].mxu0 }
 0x311   : > { %v1989_v23 = vadd.f32 %v3264_v7, %v1988_v22  ;;  %v2600_v38 = vpop.f32.mrb[78].mxu0 }
 0x312   : > { %2113 = vst [vmem:[%s3269_s23 + $0x170] sm:$0xff] %v1997_v2  ;;  %v2000_v50 = vadd.f32 %v2600_v38, %v3264_v7  ;;  %v1991_v34 = vpop.f32.mrb[79].mxu0 }
 0x313   : > { %2111 = vst [vmem:[%s3269_s23 + $0x160] sm:$0xff] %v1989_v23  ;;  %v1992_v4 = vadd.f32 %v3264_v7, %v1991_v34 }
 0x314   : > { %2114 = vst [vmem:[%s3269_s23 + $0x178] sm:$0xff] %v2000_v50 }
 0x315   : > { %2112 = vst [vmem:[%s3269_s23 + $0x168] sm:$0xff] %v1992_v4 }
 0x317   : > { %v2603_v18 = vpop.f32.mrb[80].mxu0 }
 0x318   : > { %v2013_v27 = vadd.f32 %v2603_v18, %v3264_v7  ;;  %v2004_v16 = vpop.f32.mrb[81].mxu0 }
 0x319   : > { %v2005_v32 = vadd.f32 %v3264_v7, %v2004_v16  ;;  %v2604_v33 = vpop.f32.mrb[82].mxu0 }
 0x31a   : > { %2117 = vst [vmem:[%s3269_s23 + $0x190] sm:$0xff] %v2013_v27  ;;  %v2016_v57 = vadd.f32 %v2604_v33, %v3264_v7  ;;  %v2007_v19 = vpop.f32.mrb[83].mxu0 }
 0x31b   : > { %2115 = vst [vmem:[%s3269_s23 + $0x180] sm:$0xff] %v2005_v32  ;;  %v2008_v24 = vadd.f32 %v3264_v7, %v2007_v19 }
 0x31c   : > { %2118 = vst [vmem:[%s3269_s23 + $0x198] sm:$0xff] %v2016_v57 }
 0x31d   : > { %2116 = vst [vmem:[%s3269_s23 + $0x188] sm:$0xff] %v2008_v24 }
 0x31f   : > { %v2607_v30 = vpop.f32.mrb[84].mxu0 }
 0x320   : > { %v2029_v36 = vadd.f32 %v2607_v30, %v3264_v7  ;;  %v2020_v54 = vpop.f32.mrb[85].mxu0 }
 0x321   : > { %v2021_v3 = vadd.f32 %v3264_v7, %v2020_v54  ;;  %v2608_v15 = vpop.f32.mrb[86].mxu0 }
 0x322   : > { %2121 = vst [vmem:[%s3269_s23 + $0x1b0] sm:$0xff] %v2029_v36  ;;  %v2032_v12 = vadd.f32 %v2608_v15, %v3264_v7  ;;  %v2023_v43 = vpop.f32.mrb[87].mxu0 }
 0x323   : > { %2119 = vst [vmem:[%s3269_s23 + $0x1a0] sm:$0xff] %v2021_v3  ;;  %v2024_v45 = vadd.f32 %v3264_v7, %v2023_v43 }
 0x324   : > { %2122 = vst [vmem:[%s3269_s23 + $0x1b8] sm:$0xff] %v2032_v12 }
 0x325   : > { %2120 = vst [vmem:[%s3269_s23 + $0x1a8] sm:$0xff] %v2024_v45 }
 0x327   : > { %v2611_v61 = vpop.f32.mrb[88].mxu0 }
 0x328   : > { %v2045_v17 = vadd.f32 %v2611_v61, %v3264_v7  ;;  %v2036_v47 = vpop.f32.mrb[89].mxu0 }
 0x329   : > { %v2037_v25 = vadd.f32 %v3264_v7, %v2036_v47  ;;  %v2612_v53 = vpop.f32.mrb[90].mxu0 }
 0x32a   : > { %2125 = vst [vmem:[%s3269_s23 + $0x1d0] sm:$0xff] %v2045_v17  ;;  %v2048_v14 = vadd.f32 %v2612_v53, %v3264_v7  ;;  %v2039_v37 = vpop.f32.mrb[91].mxu0 }
 0x32b   : > { %2123 = vst [vmem:[%s3269_s23 + $0x1c0] sm:$0xff] %v2037_v25  ;;  %v2040_v29 = vadd.f32 %v3264_v7, %v2039_v37 }
 0x32c   : > { %2126 = vst [vmem:[%s3269_s23 + $0x1d8] sm:$0xff] %v2048_v14 }
 0x32d   : > { %2124 = vst [vmem:[%s3269_s23 + $0x1c8] sm:$0xff] %v2040_v29 }
 0x32f   : > { %v2615_v46 = vpop.f32.mrb[92].mxu0 }
 0x330   : > { %v2061_v21 = vadd.f32 %v2615_v46, %v3264_v7  ;;  %v2052_v10 = vpop.f32.mrb[93].mxu0 }
 0x331   : > { %v2053_v60 = vadd.f32 %v3264_v7, %v2052_v10  ;;  %v2616_v41 = vpop.f32.mrb[94].mxu0 }
 0x332   : > { %2129 = vst [vmem:[%s3269_s23 + $0x1f0] sm:$0xff] %v2061_v21  ;;  %v2064_v55 = vadd.f32 %v2616_v41, %v3264_v7  ;;  %v2055_v11 = vpop.f32.mrb[95].mxu0 }
 0x333   : > { %2127 = vst [vmem:[%s3269_s23 + $0x1e0] sm:$0xff] %v2053_v60  ;;  %v2056_v28 = vadd.f32 %v3264_v7, %v2055_v11 }
 0x334   : > { %2130 = vst [vmem:[%s3269_s23 + $0x1f8] sm:$0xff] %v2064_v55 }
 0x335   : > { %2128 = vst [vmem:[%s3269_s23 + $0x1e8] sm:$0xff] %v2056_v28 }
 0x336 PF: > { %s17_s24 = sadd.s32 1, %s2703_s24  }
 0x337   : > { %p14_p4 = scmp.ge.s32.totalorder %s17_s24, 4  }
 0x339   :  { %16 = sbr.rel (!%p14_p4) target bundleno = 1 (0x1), region = 78 }

</bundles_post_ra>
